<compile_context>
chip_gen: v5e
topology: v5e:2x2
jax: 0.10.0
libtpu: 0.0.40
codegen_flags: <defaults>
</compile_context>

<pallas_src>
import functools
import math

import jax
import jax.numpy as jnp
from jax.experimental import pallas as pl
from jax.experimental.pallas import tpu as pltpu

LN_EPS = 1e-5  # nn.LayerNorm default


# ---------------------------------------------------------------------------
# in-kernel math helpers
# ---------------------------------------------------------------------------
def _layernorm(x, w, b):
    mu = jnp.mean(x, axis=-1, keepdims=True)
    var = jnp.mean((x - mu) ** 2, axis=-1, keepdims=True)
    return (x - mu) * jax.lax.rsqrt(var + LN_EPS) * w + b


def _gelu_tanh(x):
    # tanh-approximation GELU (runs on the EUP slot); not bit-exact with
    # torch.nn.GELU()'s exact erf, but within ~1e-3 and far cheaper on VALU.
    c = math.sqrt(2.0 / math.pi)
    return 0.5 * x * (1.0 + jnp.tanh(c * (x + 0.044715 * x * x * x)))


# ---------------------------------------------------------------------------
# Pallas kernels
# ---------------------------------------------------------------------------
def fused_blocks_kernel(num_heads, tokens_per_batch,
                        x_ref,                      # (R, D) f32 input rows (R = Bt*N)
                        n1w, n1b,                   # (1, 1, D) f32
                        wqkv,                       # (1, D, 3D) bf16 (q cols pre-scaled)
                        wproj, bproj,               # (1, D, D) bf16, (1, 1, D) f32
                        n2w, n2b,                   # (1, 1, D) f32
                        wf1, bf1,                   # (1, D, Hm) bf16, (1, 1, Hm) f32
                        wf2, bf2,                   # (1, Hm, D) bf16, (1, 1, D) f32
                        o_ref):                     # (R, D) f32, resident across depth
    d = pl.program_id(1)

    # Load the initial activations into the resident output block once.
    @pl.when(d == 0)
    def _():
        o_ref[...] = x_ref[...]

    x = o_ref[...].astype(jnp.float32)              # (R, D), batch rows folded into M
    R, D = x.shape
    N = tokens_per_batch
    Bt = R // N
    H = num_heads
    dh = D // H

    # ----- attention -----
    xn = _layernorm(x, n1w[0, 0], n1b[0, 0])
    # q-scale is pre-folded into wqkv; cast the whole qkv activation to bf16
    # once (halves its live VMEM footprint, no per-head scale/cast).
    qkv = jnp.dot(xn.astype(jnp.bfloat16), wqkv[0],
                  preferred_element_type=jnp.float32).astype(jnp.bfloat16)  # (R, 3D)

    wp = wproj[0]                                   # (D, D) bf16
    attn_rows = []
    for b in range(Bt):                             # attention is per batch element
        qkv_b = qkv[b * N:(b + 1) * N, :]           # (N, 3D) bf16 (sublane-aligned slice)
        acc_b = jnp.zeros((N, D), jnp.float32)
        for h in range(H):                          # static unroll over heads
            q_h = qkv_b[:, h * dh:(h + 1) * dh]
            k_h = qkv_b[:, D + h * dh:D + (h + 1) * dh]
            v_h = qkv_b[:, 2 * D + h * dh:2 * D + (h + 1) * dh]
            # scores (N, N): contract on dh; no explicit transpose materialized.
            s = jax.lax.dot_general(q_h, k_h, (((1,), (1,)), ((), ())),
                                    preferred_element_type=jnp.float32)
            s = s - jnp.max(s, axis=-1, keepdims=True)
            p = jnp.exp(s)
            p = p * pl.reciprocal(jnp.sum(p, axis=-1, keepdims=True), approx=True)
            ctx_h = jnp.dot(p.astype(jnp.bfloat16), v_h,
                            preferred_element_type=jnp.float32)       # (N, dh)
            # Per-head output-projection accumulation: avoids concatenating H
            # lane-width-dh pieces (XLU relayout); stays on the MXU.
            acc_b = acc_b + jnp.dot(ctx_h.astype(jnp.bfloat16),
                                    wp[h * dh:(h + 1) * dh, :],
                                    preferred_element_type=jnp.float32)
        attn_rows.append(acc_b)
    # Row (sublane-axis) concat of vreg-aligned (N, D) pieces: placement only.
    attn_out = attn_rows[0] if Bt == 1 else jnp.concatenate(attn_rows, axis=0)
    x = x + attn_out + bproj[0, 0]

    # ----- MLP -----
    xn2 = _layernorm(x, n2w[0, 0], n2b[0, 0])
    hdn = jnp.dot(xn2.astype(jnp.bfloat16), wf1[0],
                  preferred_element_type=jnp.float32) + bf1[0, 0]
    hdn = _gelu_tanh(hdn)
    mlp_out = jnp.dot(hdn.astype(jnp.bfloat16), wf2[0],
                      preferred_element_type=jnp.float32) + bf2[0, 0]
    x = x + mlp_out

    o_ref[...] = x.astype(o_ref.dtype)


def head_kernel(num_keep, x_ref, nw, nb, w_ref, b_ref, o_ref):
    """Final LayerNorm on the last `num_keep` tokens + fused (rgb | depth) head."""
    N = x_ref.shape[1]
    x = x_ref[0].astype(jnp.float32)[N - num_keep:, :]   # (nr, D) token selection in-kernel
    xn = _layernorm(x, nw[0], nb[0])
    o_ref[0] = (jnp.dot(xn.astype(jnp.bfloat16), w_ref[...],
                        preferred_element_type=jnp.float32)
                + b_ref[0]).astype(o_ref.dtype)


# ---------------------------------------------------------------------------
# wrappers
# ---------------------------------------------------------------------------
def _vmem_limit_bytes():
    # ~3/4 of physical VMEM: ~48 MiB on v7x (64 MiB), ~96 MiB on v5e/v6e (128 MiB).
    cap = 64 * 1024 * 1024
    try:
        info = pltpu.get_tpu_info()
        cap = int(getattr(info, "vmem_capacity_bytes", cap))
    except Exception:
        pass
    return int(cap * 3 // 4)


def _pick_batch_block(B, N, target_rows=256):
    """Fold batches into the matmul M dimension (target >= target_rows rows per
    block).  Keep >=2 grid groups for v7x's two TensorCores only when each
    group would still have >=128 rows (otherwise MXU M-starvation dominates)."""
    bt = max(1, min(B, target_rows // max(N, 1)))
    while bt > 1 and B % bt != 0:
        bt -= 1
    if bt > 1 and B // bt < 2:
        half = max(1, bt // 2)
        while half > 1 and B % half != 0:
            half -= 1
        if B % half == 0 and B // half >= 2 and half * N >= 128:
            bt = half
    return bt


def run_blocks(x, block_params, num_heads):
    B, N, D = x.shape
    depth = block_params[0].shape[0]
    bt = _pick_batch_block(B, N)
    groups = B // bt
    rows_per_block = bt * N

    # Flatten batch into rows outside the kernel (metadata-only reshape) so the
    # in-kernel matmuls see M = bt*N rows per pass.
    x2 = x.reshape(B * N, D)

    # All stacked weights are rank-3 (depth, r, c): stream one layer per depth step.
    weight_specs = [pl.BlockSpec((1,) + p.shape[1:], lambda g, d: (d, 0, 0))
                    for p in block_params]
    in_specs = [pl.BlockSpec((rows_per_block, D), lambda g, d: (g, 0))] + weight_specs

    out = pl.pallas_call(
        functools.partial(fused_blocks_kernel, num_heads, N),
        out_shape=jax.ShapeDtypeStruct((B * N, D), jnp.float32),
        grid=(groups, depth),
        in_specs=in_specs,
        out_specs=pl.BlockSpec((rows_per_block, D), lambda g, d: (g, 0)),
        compiler_params=pltpu.CompilerParams(
            dimension_semantics=("parallel", "arbitrary"),
            vmem_limit_bytes=_vmem_limit_bytes()),
    )(x2, *block_params)
    return out.reshape(B, N, D)


def run_heads(x, head_params, num_classes, return_token_num):
    """Final norm + both heads, fused; selects the last return_token_num tokens
    via the kernel (no XLA slice/copy of the decoder output in between)."""
    B, N, D = x.shape
    nr = return_token_num if return_token_num > 0 else N
    nw, nb, w_cat, b_cat = head_params
    C2 = w_cat.shape[1]                             # 2 * num_classes, lane-dense
    out = pl.pallas_call(
        functools.partial(head_kernel, nr),
        out_shape=jax.ShapeDtypeStruct((B, nr, C2), jnp.float32),
        grid=(B,),
        in_specs=[pl.BlockSpec((1, N, D), lambda b: (b, 0, 0)),
                  pl.BlockSpec((1, D), lambda b: (0, 0)),
                  pl.BlockSpec((1, D), lambda b: (0, 0)),
                  pl.BlockSpec((D, C2), lambda b: (0, 0)),
                  pl.BlockSpec((1, C2), lambda b: (0, 0))],
        out_specs=pl.BlockSpec((1, nr, C2), lambda b: (b, 0, 0)),
        compiler_params=pltpu.CompilerParams(
            dimension_semantics=("parallel",)),
    )(x, nw, nb, w_cat, b_cat)
    rgb_x = out[..., :num_classes]
    depth_x = out[..., num_classes:]
    return rgb_x, depth_x


def decoder_forward(x, return_token_num, block_params, head_params, num_heads, num_classes):
    x = run_blocks(x, block_params, num_heads)
    return run_heads(x, head_params, num_classes, return_token_num)


# ---------------------------------------------------------------------------
# deterministic parameter construction (matches _init_weights; Linear weights
# pre-transposed to (in, out), matmul weights stored bf16, LN/bias f32; the
# attention q scale 1/sqrt(dh) is folded into wqkv's q columns).
# ---------------------------------------------------------------------------
def xavier_uniform(key, fan_in, fan_out):
    bound = math.sqrt(6.0 / (fan_in + fan_out))
    return jax.random.uniform(key, (fan_in, fan_out), jnp.float32, -bound, bound)


def make_params(key, embed_dim, depth, num_heads, mlp_ratio, num_classes):
    D = embed_dim
    Hm = int(D * mlp_ratio)
    dh = D // num_heads
    scale = dh ** -0.5
    keys = jax.random.split(key, depth * 4 + 2)

    wqkv_l, wproj_l, wf1_l, wf2_l = [], [], [], []
    for i in range(depth):
        k_qkv, k_proj, k_f1, k_f2 = keys[4 * i:4 * i + 4]
        wqkv = xavier_uniform(k_qkv, D, 3 * D)            # qkv (no bias; qkv_bias=False)
        wqkv = wqkv.at[:, :D].multiply(scale)             # fold q scale into weights
        wqkv_l.append(wqkv)
        wproj_l.append(xavier_uniform(k_proj, D, D))
        wf1_l.append(xavier_uniform(k_f1, D, Hm))
        wf2_l.append(xavier_uniform(k_f2, Hm, D))

    block_params = [
        jnp.ones((depth, 1, D), jnp.float32),             # norm1 weight
        jnp.zeros((depth, 1, D), jnp.float32),            # norm1 bias
        jnp.stack(wqkv_l).astype(jnp.bfloat16),           # qkv weight (q pre-scaled)
        jnp.stack(wproj_l).astype(jnp.bfloat16),          # proj weight
        jnp.zeros((depth, 1, D), jnp.float32),            # proj bias
        jnp.ones((depth, 1, D), jnp.float32),             # norm2 weight
        jnp.zeros((depth, 1, D), jnp.float32),            # norm2 bias
        jnp.stack(wf1_l).astype(jnp.bfloat16),            # mlp fc1 weight
        jnp.zeros((depth, 1, Hm), jnp.float32),           # mlp fc1 bias
        jnp.stack(wf2_l).astype(jnp.bfloat16),            # mlp fc2 weight
        jnp.zeros((depth, 1, D), jnp.float32),            # mlp fc2 bias
    ]

    k_rgb, k_dep = keys[-2], keys[-1]
    w_cat = jnp.concatenate([xavier_uniform(k_rgb, D, num_classes),
                             xavier_uniform(k_dep, D, num_classes)],
                            axis=1).astype(jnp.bfloat16)  # (D, 2C): rgb | depth
    head_params = [
        jnp.ones((1, D), jnp.float32),                    # final norm weight
        jnp.zeros((1, D), jnp.float32),                   # final norm bias
        w_cat,                                            # concatenated head weights
        jnp.zeros((1, 2 * num_classes), jnp.float32),     # concatenated head biases
    ]
    return block_params, head_params


# ---------------------------------------------------------------------------
if __name__ == "__main__":
    # small-but-consistent config: num_classes == 4 * tubelet_size * patch_size**2
    patch_size = 4
    tubelet_size = 2
    num_classes = 4 * tubelet_size * patch_size ** 2      # 128 (lane-dense)
    embed_dim = 128                                       # lane-dense D
    depth = 2
    num_heads = 4
    mlp_ratio = 4.0

    B, N = 2, 8
    return_token_num = 4

    key = jax.random.PRNGKey(0)
    k_x, k_p = jax.random.split(key)
    x = jax.random.normal(k_x, (B, N, embed_dim), jnp.float32)

    block_params, head_params = make_params(k_p, embed_dim, depth, num_heads,
                                            mlp_ratio, num_classes)

    rgb_x, depth_x = decoder_forward(x, return_token_num, block_params,
                                     head_params, num_heads, num_classes)
    jax.block_until_ready((rgb_x, depth_x))

    assert rgb_x.shape == (B, return_token_num, num_classes)
    assert depth_x.shape == (B, return_token_num, num_classes)
    assert bool(jnp.all(jnp.isfinite(rgb_x))) and bool(jnp.all(jnp.isfinite(depth_x)))
    print("KERNEL_OK")
</pallas_src>

<mosaic_0001>
module attributes {stable_mosaic.version = 11 : i64} {
  func.func @fused_blocks_kernel(%arg0: i32, %arg1: i32, %arg2: memref<16x128xf32, #tpu.memory_space<vmem>>, %arg3: memref<1x1x128xf32, #tpu.memory_space<vmem>>, %arg4: memref<1x1x128xf32, #tpu.memory_space<vmem>>, %arg5: memref<1x128x384xbf16, #tpu.memory_space<vmem>>, %arg6: memref<1x128x128xbf16, #tpu.memory_space<vmem>>, %arg7: memref<1x1x128xf32, #tpu.memory_space<vmem>>, %arg8: memref<1x1x128xf32, #tpu.memory_space<vmem>>, %arg9: memref<1x1x128xf32, #tpu.memory_space<vmem>>, %arg10: memref<1x128x512xbf16, #tpu.memory_space<vmem>>, %arg11: memref<1x1x512xf32, #tpu.memory_space<vmem>>, %arg12: memref<1x512x128xbf16, #tpu.memory_space<vmem>>, %arg13: memref<1x1x128xf32, #tpu.memory_space<vmem>>, %arg14: memref<16x128xf32, #tpu.memory_space<vmem>>) attributes {dimension_semantics = [#tpu.dimension_semantics<parallel>, #tpu.dimension_semantics<arbitrary>], iteration_bounds = array<i64: 1, 2>, scalar_prefetch = 0 : i64, scratch_operands = 0 : i64, tpu.core_type = #tpu.core_type<tc>, window_params = [{transform_indices = @transform_0, window_bounds = array<i64: 16, 128>}, {transform_indices = @transform_1, window_bounds = array<i64: 1, 1, 128>}, {transform_indices = @transform_2, window_bounds = array<i64: 1, 1, 128>}, {transform_indices = @transform_3, window_bounds = array<i64: 1, 128, 384>}, {transform_indices = @transform_4, window_bounds = array<i64: 1, 128, 128>}, {transform_indices = @transform_5, window_bounds = array<i64: 1, 1, 128>}, {transform_indices = @transform_6, window_bounds = array<i64: 1, 1, 128>}, {transform_indices = @transform_7, window_bounds = array<i64: 1, 1, 128>}, {transform_indices = @transform_8, window_bounds = array<i64: 1, 128, 512>}, {transform_indices = @transform_9, window_bounds = array<i64: 1, 1, 512>}, {transform_indices = @transform_10, window_bounds = array<i64: 1, 512, 128>}, {transform_indices = @transform_11, window_bounds = array<i64: 1, 1, 128>}, {transform_indices = @transform_12, window_bounds = array<i64: 16, 128>}]} {
    %c0_i32 = arith.constant 0 : i32
    %0 = arith.cmpi eq, %arg1, %c0_i32 : i32
    %1 = arith.extui %0 : i1 to i32
    %c0_i32_0 = arith.constant 0 : i32
    %2 = arith.cmpi ne, %1, %c0_i32_0 : i32
    scf.if %2 {
      %c0_95 = arith.constant 0 : index
      %c0_96 = arith.constant 0 : index
      %271 = vector.load %arg2[%c0_95, %c0_96] : memref<16x128xf32, #tpu.memory_space<vmem>>, vector<16x128xf32>
      %c0_97 = arith.constant 0 : index
      %c0_98 = arith.constant 0 : index
      %272 = vector.load %arg14[%c0_97, %c0_98] : memref<16x128xf32, #tpu.memory_space<vmem>>, vector<16x128xf32>
      tpu.vector_store %arg14[%c0_97, %c0_98], %271 {strides = array<i32>} : memref<16x128xf32, #tpu.memory_space<vmem>>, vector<16x128xf32>,
    } else {
    }
    %c0 = arith.constant 0 : index
    %c0_1 = arith.constant 0 : index
    %3 = vector.load %arg14[%c0, %c0_1] : memref<16x128xf32, #tpu.memory_space<vmem>>, vector<16x128xf32>
    %c0_2 = arith.constant 0 : index
    %c0_3 = arith.constant 0 : index
    %c0_4 = arith.constant 0 : index
    %4 = vector.load %arg3[%c0_2, %c0_3, %c0_4] : memref<1x1x128xf32, #tpu.memory_space<vmem>>, vector<1x1x128xf32>
    %5 = vector.shape_cast %4 : vector<1x1x128xf32> to vector<128xf32>
    %c0_5 = arith.constant 0 : index
    %c0_6 = arith.constant 0 : index
    %c0_7 = arith.constant 0 : index
    %6 = vector.load %arg4[%c0_5, %c0_6, %c0_7] : memref<1x1x128xf32, #tpu.memory_space<vmem>>, vector<1x1x128xf32>
    %7 = vector.shape_cast %6 : vector<1x1x128xf32> to vector<128xf32>
    %cst = arith.constant dense<0.000000e+00> : vector<16xf32>
    %8 = vector.multi_reduction <add>, %3, %cst [1] : vector<16x128xf32> to vector<16xf32>
    %9 = vector.shape_cast %8 : vector<16xf32> to vector<16x1xf32>
    %cst_8 = arith.constant 1.280000e+02 : f32
    %10 = vector.broadcast %cst_8 : f32 to vector<16x1xf32>
    %11 = arith.divf %9, %10 : vector<16x1xf32>
    %12 = vector.broadcast %11 : vector<16x1xf32> to vector<16x128xf32>
    %13 = arith.subf %3, %12 : vector<16x128xf32>
    %14 = arith.mulf %13, %13 : vector<16x128xf32>
    %cst_9 = arith.constant dense<0.000000e+00> : vector<16xf32>
    %15 = vector.multi_reduction <add>, %14, %cst_9 [1] : vector<16x128xf32> to vector<16xf32>
    %16 = vector.shape_cast %15 : vector<16xf32> to vector<16x1xf32>
    %cst_10 = arith.constant 1.280000e+02 : f32
    %17 = vector.broadcast %cst_10 : f32 to vector<16x1xf32>
    %18 = arith.divf %16, %17 : vector<16x1xf32>
    %19 = vector.broadcast %11 : vector<16x1xf32> to vector<16x128xf32>
    %20 = arith.subf %3, %19 : vector<16x128xf32>
    %cst_11 = arith.constant 9.99999974E-6 : f32
    %21 = vector.broadcast %cst_11 : f32 to vector<16x1xf32>
    %22 = arith.addf %18, %21 : vector<16x1xf32>
    %23 = math.rsqrt %22 : vector<16x1xf32>
    %24 = vector.broadcast %23 : vector<16x1xf32> to vector<16x128xf32>
    %25 = arith.mulf %20, %24 : vector<16x128xf32>
    %26 = vector.shape_cast %5 : vector<128xf32> to vector<1x128xf32>
    %27 = vector.broadcast %26 : vector<1x128xf32> to vector<16x128xf32>
    %28 = arith.mulf %25, %27 : vector<16x128xf32>
    %29 = vector.shape_cast %7 : vector<128xf32> to vector<1x128xf32>
    %30 = vector.broadcast %29 : vector<1x128xf32> to vector<16x128xf32>
    %31 = arith.addf %28, %30 : vector<16x128xf32>
    %32 = arith.truncf %31 : vector<16x128xf32> to vector<16x128xbf16>
    %c0_12 = arith.constant 0 : index
    %c0_13 = arith.constant 0 : index
    %c0_14 = arith.constant 0 : index
    %33 = vector.load %arg5[%c0_12, %c0_13, %c0_14] : memref<1x128x384xbf16, #tpu.memory_space<vmem>>, vector<1x128x384xbf16>
    %34 = vector.shape_cast %33 : vector<1x128x384xbf16> to vector<128x384xbf16>
    %cst_15 = arith.constant dense<0.000000e+00> : vector<16x384xf32>
    %35 = tpu.matmul %32, %34, %cst_15 {dimension_numbers = #tpu.dot_dimension_numbers<[1], [0], [0], [1], [0, 0, 1, 1], [], []>} : vector<16x128xbf16>, vector<128x384xbf16>, vector<16x384xf32> -> vector<16x384xf32>
    %36 = arith.truncf %35 : vector<16x384xf32> to vector<16x384xbf16>
    %c0_16 = arith.constant 0 : index
    %c0_17 = arith.constant 0 : index
    %c0_18 = arith.constant 0 : index
    %37 = vector.load %arg6[%c0_16, %c0_17, %c0_18] : memref<1x128x128xbf16, #tpu.memory_space<vmem>>, vector<1x128x128xbf16>
    %38 = vector.shape_cast %37 : vector<1x128x128xbf16> to vector<128x128xbf16>
    %39 = vector.extract_strided_slice %36 {offsets = [0, 0], sizes = [8, 384], strides = [1, 1]} : vector<16x384xbf16> to vector<8x384xbf16>
    %cst_19 = arith.constant 0.000000e+00 : f32
    %40 = vector.broadcast %cst_19 : f32 to vector<8x128xf32>
    %41 = vector.extract_strided_slice %39 {offsets = [0, 0], sizes = [8, 32], strides = [1, 1]} : vector<8x384xbf16> to vector<8x32xbf16>
    %42 = vector.extract_strided_slice %39 {offsets = [0, 128], sizes = [8, 32], strides = [1, 1]} : vector<8x384xbf16> to vector<8x32xbf16>
    %43 = vector.extract_strided_slice %39 {offsets = [0, 256], sizes = [8, 32], strides = [1, 1]} : vector<8x384xbf16> to vector<8x32xbf16>
    %cst_20 = arith.constant dense<0.000000e+00> : vector<8x8xf32>
    %44 = tpu.matmul %41, %42, %cst_20 {dimension_numbers = #tpu.dot_dimension_numbers<[1], [1], [0], [0], [0, 0, 1, 0], [], []>} : vector<8x32xbf16>, vector<8x32xbf16>, vector<8x8xf32> -> vector<8x8xf32>
    %cst_21 = arith.constant dense<0xFF800000> : vector<8xf32>
    %45 = vector.multi_reduction <maximumf>, %44, %cst_21 [1] : vector<8x8xf32> to vector<8xf32>
    %46 = vector.shape_cast %45 : vector<8xf32> to vector<8x1xf32>
    %47 = vector.broadcast %46 : vector<8x1xf32> to vector<8x8xf32>
    %48 = arith.subf %44, %47 : vector<8x8xf32>
    %49 = math.exp %48 : vector<8x8xf32>
    %cst_22 = arith.constant dense<0.000000e+00> : vector<8xf32>
    %50 = vector.multi_reduction <add>, %49, %cst_22 [1] : vector<8x8xf32> to vector<8xf32>
    %51 = vector.shape_cast %50 : vector<8xf32> to vector<8x1xf32>
    %52 = tpu.reciprocal %51 {approx = true} : vector<8x1xf32> -> vector<8x1xf32>
    %53 = vector.broadcast %52 : vector<8x1xf32> to vector<8x8xf32>
    %54 = arith.mulf %49, %53 : vector<8x8xf32>
    %55 = arith.truncf %54 : vector<8x8xf32> to vector<8x8xbf16>
    %cst_23 = arith.constant dense<0.000000e+00> : vector<8x32xf32>
    %56 = tpu.matmul %55, %43, %cst_23 {dimension_numbers = #tpu.dot_dimension_numbers<[1], [0], [0], [1], [0, 0, 1, 1], [], []>} : vector<8x8xbf16>, vector<8x32xbf16>, vector<8x32xf32> -> vector<8x32xf32>
    %57 = arith.truncf %56 : vector<8x32xf32> to vector<8x32xbf16>
    %58 = vector.extract_strided_slice %38 {offsets = [0, 0], sizes = [32, 128], strides = [1, 1]} : vector<128x128xbf16> to vector<32x128xbf16>
    %cst_24 = arith.constant dense<0.000000e+00> : vector<8x128xf32>
    %59 = tpu.matmul %57, %58, %cst_24 {dimension_numbers = #tpu.dot_dimension_numbers<[1], [0], [0], [1], [0, 0, 1, 1], [], []>} : vector<8x32xbf16>, vector<32x128xbf16>, vector<8x128xf32> -> vector<8x128xf32>
    %60 = arith.addf %40, %59 : vector<8x128xf32>
    %61 = vector.extract_strided_slice %39 {offsets = [0, 32], sizes = [8, 32], strides = [1, 1]} : vector<8x384xbf16> to vector<8x32xbf16>
    %62 = vector.extract_strided_slice %39 {offsets = [0, 160], sizes = [8, 32], strides = [1, 1]} : vector<8x384xbf16> to vector<8x32xbf16>
    %63 = vector.extract_strided_slice %39 {offsets = [0, 288], sizes = [8, 32], strides = [1, 1]} : vector<8x384xbf16> to vector<8x32xbf16>
    %cst_25 = arith.constant dense<0.000000e+00> : vector<8x8xf32>
    %64 = tpu.matmul %61, %62, %cst_25 {dimension_numbers = #tpu.dot_dimension_numbers<[1], [1], [0], [0], [0, 0, 1, 0], [], []>} : vector<8x32xbf16>, vector<8x32xbf16>, vector<8x8xf32> -> vector<8x8xf32>
    %cst_26 = arith.constant dense<0xFF800000> : vector<8xf32>
    %65 = vector.multi_reduction <maximumf>, %64, %cst_26 [1] : vector<8x8xf32> to vector<8xf32>
    %66 = vector.shape_cast %65 : vector<8xf32> to vector<8x1xf32>
    %67 = vector.broadcast %66 : vector<8x1xf32> to vector<8x8xf32>
    %68 = arith.subf %64, %67 : vector<8x8xf32>
    %69 = math.exp %68 : vector<8x8xf32>
    %cst_27 = arith.constant dense<0.000000e+00> : vector<8xf32>
    %70 = vector.multi_reduction <add>, %69, %cst_27 [1] : vector<8x8xf32> to vector<8xf32>
    %71 = vector.shape_cast %70 : vector<8xf32> to vector<8x1xf32>
    %72 = tpu.reciprocal %71 {approx = true} : vector<8x1xf32> -> vector<8x1xf32>
    %73 = vector.broadcast %72 : vector<8x1xf32> to vector<8x8xf32>
    %74 = arith.mulf %69, %73 : vector<8x8xf32>
    %75 = arith.truncf %74 : vector<8x8xf32> to vector<8x8xbf16>
    %cst_28 = arith.constant dense<0.000000e+00> : vector<8x32xf32>
    %76 = tpu.matmul %75, %63, %cst_28 {dimension_numbers = #tpu.dot_dimension_numbers<[1], [0], [0], [1], [0, 0, 1, 1], [], []>} : vector<8x8xbf16>, vector<8x32xbf16>, vector<8x32xf32> -> vector<8x32xf32>
    %77 = arith.truncf %76 : vector<8x32xf32> to vector<8x32xbf16>
    %78 = vector.extract_strided_slice %38 {offsets = [32, 0], sizes = [32, 128], strides = [1, 1]} : vector<128x128xbf16> to vector<32x128xbf16>
    %cst_29 = arith.constant dense<0.000000e+00> : vector<8x128xf32>
    %79 = tpu.matmul %77, %78, %cst_29 {dimension_numbers = #tpu.dot_dimension_numbers<[1], [0], [0], [1], [0, 0, 1, 1], [], []>} : vector<8x32xbf16>, vector<32x128xbf16>, vector<8x128xf32> -> vector<8x128xf32>
    %80 = arith.addf %60, %79 : vector<8x128xf32>
    %81 = vector.extract_strided_slice %39 {offsets = [0, 64], sizes = [8, 32], strides = [1, 1]} : vector<8x384xbf16> to vector<8x32xbf16>
    %82 = vector.extract_strided_slice %39 {offsets = [0, 192], sizes = [8, 32], strides = [1, 1]} : vector<8x384xbf16> to vector<8x32xbf16>
    %83 = vector.extract_strided_slice %39 {offsets = [0, 320], sizes = [8, 32], strides = [1, 1]} : vector<8x384xbf16> to vector<8x32xbf16>
    %cst_30 = arith.constant dense<0.000000e+00> : vector<8x8xf32>
    %84 = tpu.matmul %81, %82, %cst_30 {dimension_numbers = #tpu.dot_dimension_numbers<[1], [1], [0], [0], [0, 0, 1, 0], [], []>} : vector<8x32xbf16>, vector<8x32xbf16>, vector<8x8xf32> -> vector<8x8xf32>
    %cst_31 = arith.constant dense<0xFF800000> : vector<8xf32>
    %85 = vector.multi_reduction <maximumf>, %84, %cst_31 [1] : vector<8x8xf32> to vector<8xf32>
    %86 = vector.shape_cast %85 : vector<8xf32> to vector<8x1xf32>
    %87 = vector.broadcast %86 : vector<8x1xf32> to vector<8x8xf32>
    %88 = arith.subf %84, %87 : vector<8x8xf32>
    %89 = math.exp %88 : vector<8x8xf32>
    %cst_32 = arith.constant dense<0.000000e+00> : vector<8xf32>
    %90 = vector.multi_reduction <add>, %89, %cst_32 [1] : vector<8x8xf32> to vector<8xf32>
    %91 = vector.shape_cast %90 : vector<8xf32> to vector<8x1xf32>
    %92 = tpu.reciprocal %91 {approx = true} : vector<8x1xf32> -> vector<8x1xf32>
    %93 = vector.broadcast %92 : vector<8x1xf32> to vector<8x8xf32>
    %94 = arith.mulf %89, %93 : vector<8x8xf32>
    %95 = arith.truncf %94 : vector<8x8xf32> to vector<8x8xbf16>
    %cst_33 = arith.constant dense<0.000000e+00> : vector<8x32xf32>
    %96 = tpu.matmul %95, %83, %cst_33 {dimension_numbers = #tpu.dot_dimension_numbers<[1], [0], [0], [1], [0, 0, 1, 1], [], []>} : vector<8x8xbf16>, vector<8x32xbf16>, vector<8x32xf32> -> vector<8x32xf32>
    %97 = arith.truncf %96 : vector<8x32xf32> to vector<8x32xbf16>
    %98 = vector.extract_strided_slice %38 {offsets = [64, 0], sizes = [32, 128], strides = [1, 1]} : vector<128x128xbf16> to vector<32x128xbf16>
    %cst_34 = arith.constant dense<0.000000e+00> : vector<8x128xf32>
    %99 = tpu.matmul %97, %98, %cst_34 {dimension_numbers = #tpu.dot_dimension_numbers<[1], [0], [0], [1], [0, 0, 1, 1], [], []>} : vector<8x32xbf16>, vector<32x128xbf16>, vector<8x128xf32> -> vector<8x128xf32>
    %100 = arith.addf %80, %99 : vector<8x128xf32>
    %101 = vector.extract_strided_slice %39 {offsets = [0, 96], sizes = [8, 32], strides = [1, 1]} : vector<8x384xbf16> to vector<8x32xbf16>
    %102 = vector.extract_strided_slice %39 {offsets = [0, 224], sizes = [8, 32], strides = [1, 1]} : vector<8x384xbf16> to vector<8x32xbf16>
    %103 = vector.extract_strided_slice %39 {offsets = [0, 352], sizes = [8, 32], strides = [1, 1]} : vector<8x384xbf16> to vector<8x32xbf16>
    %cst_35 = arith.constant dense<0.000000e+00> : vector<8x8xf32>
    %104 = tpu.matmul %101, %102, %cst_35 {dimension_numbers = #tpu.dot_dimension_numbers<[1], [1], [0], [0], [0, 0, 1, 0], [], []>} : vector<8x32xbf16>, vector<8x32xbf16>, vector<8x8xf32> -> vector<8x8xf32>
    %cst_36 = arith.constant dense<0xFF800000> : vector<8xf32>
    %105 = vector.multi_reduction <maximumf>, %104, %cst_36 [1] : vector<8x8xf32> to vector<8xf32>
    %106 = vector.shape_cast %105 : vector<8xf32> to vector<8x1xf32>
    %107 = vector.broadcast %106 : vector<8x1xf32> to vector<8x8xf32>
    %108 = arith.subf %104, %107 : vector<8x8xf32>
    %109 = math.exp %108 : vector<8x8xf32>
    %cst_37 = arith.constant dense<0.000000e+00> : vector<8xf32>
    %110 = vector.multi_reduction <add>, %109, %cst_37 [1] : vector<8x8xf32> to vector<8xf32>
    %111 = vector.shape_cast %110 : vector<8xf32> to vector<8x1xf32>
    %112 = tpu.reciprocal %111 {approx = true} : vector<8x1xf32> -> vector<8x1xf32>
    %113 = vector.broadcast %112 : vector<8x1xf32> to vector<8x8xf32>
    %114 = arith.mulf %109, %113 : vector<8x8xf32>
    %115 = arith.truncf %114 : vector<8x8xf32> to vector<8x8xbf16>
    %cst_38 = arith.constant dense<0.000000e+00> : vector<8x32xf32>
    %116 = tpu.matmul %115, %103, %cst_38 {dimension_numbers = #tpu.dot_dimension_numbers<[1], [0], [0], [1], [0, 0, 1, 1], [], []>} : vector<8x8xbf16>, vector<8x32xbf16>, vector<8x32xf32> -> vector<8x32xf32>
    %117 = arith.truncf %116 : vector<8x32xf32> to vector<8x32xbf16>
    %118 = vector.extract_strided_slice %38 {offsets = [96, 0], sizes = [32, 128], strides = [1, 1]} : vector<128x128xbf16> to vector<32x128xbf16>
    %cst_39 = arith.constant dense<0.000000e+00> : vector<8x128xf32>
    %119 = tpu.matmul %117, %118, %cst_39 {dimension_numbers = #tpu.dot_dimension_numbers<[1], [0], [0], [1], [0, 0, 1, 1], [], []>} : vector<8x32xbf16>, vector<32x128xbf16>, vector<8x128xf32> -> vector<8x128xf32>
    %120 = arith.addf %100, %119 : vector<8x128xf32>
    %121 = vector.extract_strided_slice %36 {offsets = [8, 0], sizes = [8, 384], strides = [1, 1]} : vector<16x384xbf16> to vector<8x384xbf16>
    %cst_40 = arith.constant 0.000000e+00 : f32
    %122 = vector.broadcast %cst_40 : f32 to vector<8x128xf32>
    %123 = vector.extract_strided_slice %121 {offsets = [0, 0], sizes = [8, 32], strides = [1, 1]} : vector<8x384xbf16> to vector<8x32xbf16>
    %124 = vector.extract_strided_slice %121 {offsets = [0, 128], sizes = [8, 32], strides = [1, 1]} : vector<8x384xbf16> to vector<8x32xbf16>
    %125 = vector.extract_strided_slice %121 {offsets = [0, 256], sizes = [8, 32], strides = [1, 1]} : vector<8x384xbf16> to vector<8x32xbf16>
    %cst_41 = arith.constant dense<0.000000e+00> : vector<8x8xf32>
    %126 = tpu.matmul %123, %124, %cst_41 {dimension_numbers = #tpu.dot_dimension_numbers<[1], [1], [0], [0], [0, 0, 1, 0], [], []>} : vector<8x32xbf16>, vector<8x32xbf16>, vector<8x8xf32> -> vector<8x8xf32>
    %cst_42 = arith.constant dense<0xFF800000> : vector<8xf32>
    %127 = vector.multi_reduction <maximumf>, %126, %cst_42 [1] : vector<8x8xf32> to vector<8xf32>
    %128 = vector.shape_cast %127 : vector<8xf32> to vector<8x1xf32>
    %129 = vector.broadcast %128 : vector<8x1xf32> to vector<8x8xf32>
    %130 = arith.subf %126, %129 : vector<8x8xf32>
    %131 = math.exp %130 : vector<8x8xf32>
    %cst_43 = arith.constant dense<0.000000e+00> : vector<8xf32>
    %132 = vector.multi_reduction <add>, %131, %cst_43 [1] : vector<8x8xf32> to vector<8xf32>
    %133 = vector.shape_cast %132 : vector<8xf32> to vector<8x1xf32>
    %134 = tpu.reciprocal %133 {approx = true} : vector<8x1xf32> -> vector<8x1xf32>
    %135 = vector.broadcast %134 : vector<8x1xf32> to vector<8x8xf32>
    %136 = arith.mulf %131, %135 : vector<8x8xf32>
    %137 = arith.truncf %136 : vector<8x8xf32> to vector<8x8xbf16>
    %cst_44 = arith.constant dense<0.000000e+00> : vector<8x32xf32>
    %138 = tpu.matmul %137, %125, %cst_44 {dimension_numbers = #tpu.dot_dimension_numbers<[1], [0], [0], [1], [0, 0, 1, 1], [], []>} : vector<8x8xbf16>, vector<8x32xbf16>, vector<8x32xf32> -> vector<8x32xf32>
    %139 = arith.truncf %138 : vector<8x32xf32> to vector<8x32xbf16>
    %140 = vector.extract_strided_slice %38 {offsets = [0, 0], sizes = [32, 128], strides = [1, 1]} : vector<128x128xbf16> to vector<32x128xbf16>
    %cst_45 = arith.constant dense<0.000000e+00> : vector<8x128xf32>
    %141 = tpu.matmul %139, %140, %cst_45 {dimension_numbers = #tpu.dot_dimension_numbers<[1], [0], [0], [1], [0, 0, 1, 1], [], []>} : vector<8x32xbf16>, vector<32x128xbf16>, vector<8x128xf32> -> vector<8x128xf32>
    %142 = arith.addf %122, %141 : vector<8x128xf32>
    %143 = vector.extract_strided_slice %121 {offsets = [0, 32], sizes = [8, 32], strides = [1, 1]} : vector<8x384xbf16> to vector<8x32xbf16>
    %144 = vector.extract_strided_slice %121 {offsets = [0, 160], sizes = [8, 32], strides = [1, 1]} : vector<8x384xbf16> to vector<8x32xbf16>
    %145 = vector.extract_strided_slice %121 {offsets = [0, 288], sizes = [8, 32], strides = [1, 1]} : vector<8x384xbf16> to vector<8x32xbf16>
    %cst_46 = arith.constant dense<0.000000e+00> : vector<8x8xf32>
    %146 = tpu.matmul %143, %144, %cst_46 {dimension_numbers = #tpu.dot_dimension_numbers<[1], [1], [0], [0], [0, 0, 1, 0], [], []>} : vector<8x32xbf16>, vector<8x32xbf16>, vector<8x8xf32> -> vector<8x8xf32>
    %cst_47 = arith.constant dense<0xFF800000> : vector<8xf32>
    %147 = vector.multi_reduction <maximumf>, %146, %cst_47 [1] : vector<8x8xf32> to vector<8xf32>
    %148 = vector.shape_cast %147 : vector<8xf32> to vector<8x1xf32>
    %149 = vector.broadcast %148 : vector<8x1xf32> to vector<8x8xf32>
    %150 = arith.subf %146, %149 : vector<8x8xf32>
    %151 = math.exp %150 : vector<8x8xf32>
    %cst_48 = arith.constant dense<0.000000e+00> : vector<8xf32>
    %152 = vector.multi_reduction <add>, %151, %cst_48 [1] : vector<8x8xf32> to vector<8xf32>
    %153 = vector.shape_cast %152 : vector<8xf32> to vector<8x1xf32>
    %154 = tpu.reciprocal %153 {approx = true} : vector<8x1xf32> -> vector<8x1xf32>
    %155 = vector.broadcast %154 : vector<8x1xf32> to vector<8x8xf32>
    %156 = arith.mulf %151, %155 : vector<8x8xf32>
    %157 = arith.truncf %156 : vector<8x8xf32> to vector<8x8xbf16>
    %cst_49 = arith.constant dense<0.000000e+00> : vector<8x32xf32>
    %158 = tpu.matmul %157, %145, %cst_49 {dimension_numbers = #tpu.dot_dimension_numbers<[1], [0], [0], [1], [0, 0, 1, 1], [], []>} : vector<8x8xbf16>, vector<8x32xbf16>, vector<8x32xf32> -> vector<8x32xf32>
    %159 = arith.truncf %158 : vector<8x32xf32> to vector<8x32xbf16>
    %160 = vector.extract_strided_slice %38 {offsets = [32, 0], sizes = [32, 128], strides = [1, 1]} : vector<128x128xbf16> to vector<32x128xbf16>
    %cst_50 = arith.constant dense<0.000000e+00> : vector<8x128xf32>
    %161 = tpu.matmul %159, %160, %cst_50 {dimension_numbers = #tpu.dot_dimension_numbers<[1], [0], [0], [1], [0, 0, 1, 1], [], []>} : vector<8x32xbf16>, vector<32x128xbf16>, vector<8x128xf32> -> vector<8x128xf32>
    %162 = arith.addf %142, %161 : vector<8x128xf32>
    %163 = vector.extract_strided_slice %121 {offsets = [0, 64], sizes = [8, 32], strides = [1, 1]} : vector<8x384xbf16> to vector<8x32xbf16>
    %164 = vector.extract_strided_slice %121 {offsets = [0, 192], sizes = [8, 32], strides = [1, 1]} : vector<8x384xbf16> to vector<8x32xbf16>
    %165 = vector.extract_strided_slice %121 {offsets = [0, 320], sizes = [8, 32], strides = [1, 1]} : vector<8x384xbf16> to vector<8x32xbf16>
    %cst_51 = arith.constant dense<0.000000e+00> : vector<8x8xf32>
    %166 = tpu.matmul %163, %164, %cst_51 {dimension_numbers = #tpu.dot_dimension_numbers<[1], [1], [0], [0], [0, 0, 1, 0], [], []>} : vector<8x32xbf16>, vector<8x32xbf16>, vector<8x8xf32> -> vector<8x8xf32>
    %cst_52 = arith.constant dense<0xFF800000> : vector<8xf32>
    %167 = vector.multi_reduction <maximumf>, %166, %cst_52 [1] : vector<8x8xf32> to vector<8xf32>
    %168 = vector.shape_cast %167 : vector<8xf32> to vector<8x1xf32>
    %169 = vector.broadcast %168 : vector<8x1xf32> to vector<8x8xf32>
    %170 = arith.subf %166, %169 : vector<8x8xf32>
    %171 = math.exp %170 : vector<8x8xf32>
    %cst_53 = arith.constant dense<0.000000e+00> : vector<8xf32>
    %172 = vector.multi_reduction <add>, %171, %cst_53 [1] : vector<8x8xf32> to vector<8xf32>
    %173 = vector.shape_cast %172 : vector<8xf32> to vector<8x1xf32>
    %174 = tpu.reciprocal %173 {approx = true} : vector<8x1xf32> -> vector<8x1xf32>
    %175 = vector.broadcast %174 : vector<8x1xf32> to vector<8x8xf32>
    %176 = arith.mulf %171, %175 : vector<8x8xf32>
    %177 = arith.truncf %176 : vector<8x8xf32> to vector<8x8xbf16>
    %cst_54 = arith.constant dense<0.000000e+00> : vector<8x32xf32>
    %178 = tpu.matmul %177, %165, %cst_54 {dimension_numbers = #tpu.dot_dimension_numbers<[1], [0], [0], [1], [0, 0, 1, 1], [], []>} : vector<8x8xbf16>, vector<8x32xbf16>, vector<8x32xf32> -> vector<8x32xf32>
    %179 = arith.truncf %178 : vector<8x32xf32> to vector<8x32xbf16>
    %180 = vector.extract_strided_slice %38 {offsets = [64, 0], sizes = [32, 128], strides = [1, 1]} : vector<128x128xbf16> to vector<32x128xbf16>
    %cst_55 = arith.constant dense<0.000000e+00> : vector<8x128xf32>
    %181 = tpu.matmul %179, %180, %cst_55 {dimension_numbers = #tpu.dot_dimension_numbers<[1], [0], [0], [1], [0, 0, 1, 1], [], []>} : vector<8x32xbf16>, vector<32x128xbf16>, vector<8x128xf32> -> vector<8x128xf32>
    %182 = arith.addf %162, %181 : vector<8x128xf32>
    %183 = vector.extract_strided_slice %121 {offsets = [0, 96], sizes = [8, 32], strides = [1, 1]} : vector<8x384xbf16> to vector<8x32xbf16>
    %184 = vector.extract_strided_slice %121 {offsets = [0, 224], sizes = [8, 32], strides = [1, 1]} : vector<8x384xbf16> to vector<8x32xbf16>
    %185 = vector.extract_strided_slice %121 {offsets = [0, 352], sizes = [8, 32], strides = [1, 1]} : vector<8x384xbf16> to vector<8x32xbf16>
    %cst_56 = arith.constant dense<0.000000e+00> : vector<8x8xf32>
    %186 = tpu.matmul %183, %184, %cst_56 {dimension_numbers = #tpu.dot_dimension_numbers<[1], [1], [0], [0], [0, 0, 1, 0], [], []>} : vector<8x32xbf16>, vector<8x32xbf16>, vector<8x8xf32> -> vector<8x8xf32>
    %cst_57 = arith.constant dense<0xFF800000> : vector<8xf32>
    %187 = vector.multi_reduction <maximumf>, %186, %cst_57 [1] : vector<8x8xf32> to vector<8xf32>
    %188 = vector.shape_cast %187 : vector<8xf32> to vector<8x1xf32>
    %189 = vector.broadcast %188 : vector<8x1xf32> to vector<8x8xf32>
    %190 = arith.subf %186, %189 : vector<8x8xf32>
    %191 = math.exp %190 : vector<8x8xf32>
    %cst_58 = arith.constant dense<0.000000e+00> : vector<8xf32>
    %192 = vector.multi_reduction <add>, %191, %cst_58 [1] : vector<8x8xf32> to vector<8xf32>
    %193 = vector.shape_cast %192 : vector<8xf32> to vector<8x1xf32>
    %194 = tpu.reciprocal %193 {approx = true} : vector<8x1xf32> -> vector<8x1xf32>
    %195 = vector.broadcast %194 : vector<8x1xf32> to vector<8x8xf32>
    %196 = arith.mulf %191, %195 : vector<8x8xf32>
    %197 = arith.truncf %196 : vector<8x8xf32> to vector<8x8xbf16>
    %cst_59 = arith.constant dense<0.000000e+00> : vector<8x32xf32>
    %198 = tpu.matmul %197, %185, %cst_59 {dimension_numbers = #tpu.dot_dimension_numbers<[1], [0], [0], [1], [0, 0, 1, 1], [], []>} : vector<8x8xbf16>, vector<8x32xbf16>, vector<8x32xf32> -> vector<8x32xf32>
    %199 = arith.truncf %198 : vector<8x32xf32> to vector<8x32xbf16>
    %200 = vector.extract_strided_slice %38 {offsets = [96, 0], sizes = [32, 128], strides = [1, 1]} : vector<128x128xbf16> to vector<32x128xbf16>
    %cst_60 = arith.constant dense<0.000000e+00> : vector<8x128xf32>
    %201 = tpu.matmul %199, %200, %cst_60 {dimension_numbers = #tpu.dot_dimension_numbers<[1], [0], [0], [1], [0, 0, 1, 1], [], []>} : vector<8x32xbf16>, vector<32x128xbf16>, vector<8x128xf32> -> vector<8x128xf32>
    %202 = arith.addf %182, %201 : vector<8x128xf32>
    %203 = tpu.concatenate %120, %202 in 0 : vector<8x128xf32>, vector<8x128xf32> -> vector<16x128xf32>
    %204 = arith.addf %3, %203 : vector<16x128xf32>
    %c0_61 = arith.constant 0 : index
    %c0_62 = arith.constant 0 : index
    %c0_63 = arith.constant 0 : index
    %205 = vector.load %arg7[%c0_61, %c0_62, %c0_63] : memref<1x1x128xf32, #tpu.memory_space<vmem>>, vector<1x1x128xf32>
    %206 = vector.shape_cast %205 : vector<1x1x128xf32> to vector<128xf32>
    %207 = vector.shape_cast %206 : vector<128xf32> to vector<1x128xf32>
    %208 = vector.broadcast %207 : vector<1x128xf32> to vector<16x128xf32>
    %209 = arith.addf %204, %208 : vector<16x128xf32>
    %c0_64 = arith.constant 0 : index
    %c0_65 = arith.constant 0 : index
    %c0_66 = arith.constant 0 : index
    %210 = vector.load %arg8[%c0_64, %c0_65, %c0_66] : memref<1x1x128xf32, #tpu.memory_space<vmem>>, vector<1x1x128xf32>
    %211 = vector.shape_cast %210 : vector<1x1x128xf32> to vector<128xf32>
    %c0_67 = arith.constant 0 : index
    %c0_68 = arith.constant 0 : index
    %c0_69 = arith.constant 0 : index
    %212 = vector.load %arg9[%c0_67, %c0_68, %c0_69] : memref<1x1x128xf32, #tpu.memory_space<vmem>>, vector<1x1x128xf32>
    %213 = vector.shape_cast %212 : vector<1x1x128xf32> to vector<128xf32>
    %cst_70 = arith.constant dense<0.000000e+00> : vector<16xf32>
    %214 = vector.multi_reduction <add>, %209, %cst_70 [1] : vector<16x128xf32> to vector<16xf32>
    %215 = vector.shape_cast %214 : vector<16xf32> to vector<16x1xf32>
    %cst_71 = arith.constant 1.280000e+02 : f32
    %216 = vector.broadcast %cst_71 : f32 to vector<16x1xf32>
    %217 = arith.divf %215, %216 : vector<16x1xf32>
    %218 = vector.broadcast %217 : vector<16x1xf32> to vector<16x128xf32>
    %219 = arith.subf %209, %218 : vector<16x128xf32>
    %220 = arith.mulf %219, %219 : vector<16x128xf32>
    %cst_72 = arith.constant dense<0.000000e+00> : vector<16xf32>
    %221 = vector.multi_reduction <add>, %220, %cst_72 [1] : vector<16x128xf32> to vector<16xf32>
    %222 = vector.shape_cast %221 : vector<16xf32> to vector<16x1xf32>
    %cst_73 = arith.constant 1.280000e+02 : f32
    %223 = vector.broadcast %cst_73 : f32 to vector<16x1xf32>
    %224 = arith.divf %222, %223 : vector<16x1xf32>
    %225 = vector.broadcast %217 : vector<16x1xf32> to vector<16x128xf32>
    %226 = arith.subf %209, %225 : vector<16x128xf32>
    %cst_74 = arith.constant 9.99999974E-6 : f32
    %227 = vector.broadcast %cst_74 : f32 to vector<16x1xf32>
    %228 = arith.addf %224, %227 : vector<16x1xf32>
    %229 = math.rsqrt %228 : vector<16x1xf32>
    %230 = vector.broadcast %229 : vector<16x1xf32> to vector<16x128xf32>
    %231 = arith.mulf %226, %230 : vector<16x128xf32>
    %232 = vector.shape_cast %211 : vector<128xf32> to vector<1x128xf32>
    %233 = vector.broadcast %232 : vector<1x128xf32> to vector<16x128xf32>
    %234 = arith.mulf %231, %233 : vector<16x128xf32>
    %235 = vector.shape_cast %213 : vector<128xf32> to vector<1x128xf32>
    %236 = vector.broadcast %235 : vector<1x128xf32> to vector<16x128xf32>
    %237 = arith.addf %234, %236 : vector<16x128xf32>
    %238 = arith.truncf %237 : vector<16x128xf32> to vector<16x128xbf16>
    %c0_75 = arith.constant 0 : index
    %c0_76 = arith.constant 0 : index
    %c0_77 = arith.constant 0 : index
    %239 = vector.load %arg10[%c0_75, %c0_76, %c0_77] : memref<1x128x512xbf16, #tpu.memory_space<vmem>>, vector<1x128x512xbf16>
    %240 = vector.shape_cast %239 : vector<1x128x512xbf16> to vector<128x512xbf16>
    %cst_78 = arith.constant dense<0.000000e+00> : vector<16x512xf32>
    %241 = tpu.matmul %238, %240, %cst_78 {dimension_numbers = #tpu.dot_dimension_numbers<[1], [0], [0], [1], [0, 0, 1, 1], [], []>} : vector<16x128xbf16>, vector<128x512xbf16>, vector<16x512xf32> -> vector<16x512xf32>
    %c0_79 = arith.constant 0 : index
    %c0_80 = arith.constant 0 : index
    %c0_81 = arith.constant 0 : index
    %242 = vector.load %arg11[%c0_79, %c0_80, %c0_81] : memref<1x1x512xf32, #tpu.memory_space<vmem>>, vector<1x1x512xf32>
    %243 = vector.shape_cast %242 : vector<1x1x512xf32> to vector<512xf32>
    %244 = vector.shape_cast %243 : vector<512xf32> to vector<1x512xf32>
    %245 = vector.broadcast %244 : vector<1x512xf32> to vector<16x512xf32>
    %246 = arith.addf %241, %245 : vector<16x512xf32>
    %cst_82 = arith.constant 5.000000e-01 : f32
    %247 = vector.broadcast %cst_82 : f32 to vector<16x512xf32>
    %248 = arith.mulf %247, %246 : vector<16x512xf32>
    %cst_83 = arith.constant 4.471500e-02 : f32
    %249 = vector.broadcast %cst_83 : f32 to vector<16x512xf32>
    %250 = arith.mulf %249, %246 : vector<16x512xf32>
    %251 = arith.mulf %250, %246 : vector<16x512xf32>
    %252 = arith.mulf %251, %246 : vector<16x512xf32>
    %253 = arith.addf %246, %252 : vector<16x512xf32>
    %cst_84 = arith.constant 0.797884583 : f32
    %254 = vector.broadcast %cst_84 : f32 to vector<16x512xf32>
    %255 = arith.mulf %254, %253 : vector<16x512xf32>
    %256 = math.tanh %255 : vector<16x512xf32>
    %cst_85 = arith.constant 1.000000e+00 : f32
    %257 = vector.broadcast %cst_85 : f32 to vector<16x512xf32>
    %258 = arith.addf %257, %256 : vector<16x512xf32>
    %259 = arith.mulf %248, %258 : vector<16x512xf32>
    %260 = arith.truncf %259 : vector<16x512xf32> to vector<16x512xbf16>
    %c0_86 = arith.constant 0 : index
    %c0_87 = arith.constant 0 : index
    %c0_88 = arith.constant 0 : index
    %261 = vector.load %arg12[%c0_86, %c0_87, %c0_88] : memref<1x512x128xbf16, #tpu.memory_space<vmem>>, vector<1x512x128xbf16>
    %262 = vector.shape_cast %261 : vector<1x512x128xbf16> to vector<512x128xbf16>
    %cst_89 = arith.constant dense<0.000000e+00> : vector<16x128xf32>
    %263 = tpu.matmul %260, %262, %cst_89 {dimension_numbers = #tpu.dot_dimension_numbers<[1], [0], [0], [1], [0, 0, 1, 1], [], []>} : vector<16x512xbf16>, vector<512x128xbf16>, vector<16x128xf32> -> vector<16x128xf32>
    %c0_90 = arith.constant 0 : index
    %c0_91 = arith.constant 0 : index
    %c0_92 = arith.constant 0 : index
    %264 = vector.load %arg13[%c0_90, %c0_91, %c0_92] : memref<1x1x128xf32, #tpu.memory_space<vmem>>, vector<1x1x128xf32>
    %265 = vector.shape_cast %264 : vector<1x1x128xf32> to vector<128xf32>
    %266 = vector.shape_cast %265 : vector<128xf32> to vector<1x128xf32>
    %267 = vector.broadcast %266 : vector<1x128xf32> to vector<16x128xf32>
    %268 = arith.addf %263, %267 : vector<16x128xf32>
    %269 = arith.addf %209, %268 : vector<16x128xf32>
    %c0_93 = arith.constant 0 : index
    %c0_94 = arith.constant 0 : index
    %270 = vector.load %arg14[%c0_93, %c0_94] : memref<16x128xf32, #tpu.memory_space<vmem>>, vector<16x128xf32>
    tpu.vector_store %arg14[%c0_93, %c0_94], %269 {strides = array<i32>} : memref<16x128xf32, #tpu.memory_space<vmem>>, vector<16x128xf32>,
    return
  }
  func.func @transform_0(%arg0: i32, %arg1: i32) -> (i32, i32) {
    %c0_i32 = arith.constant 0 : i32
    %c0_i32_0 = arith.constant 0 : i32
    return %arg0, %c0_i32 : i32, i32
  }
  func.func @transform_1(%arg0: i32, %arg1: i32) -> (i32, i32, i32) {
    %c0_i32 = arith.constant 0 : i32
    %c0_i32_0 = arith.constant 0 : i32
    %c0_i32_1 = arith.constant 0 : i32
    return %arg1, %c0_i32, %c0_i32_0 : i32, i32, i32
  }
  func.func @transform_2(%arg0: i32, %arg1: i32) -> (i32, i32, i32) {
    %c0_i32 = arith.constant 0 : i32
    %c0_i32_0 = arith.constant 0 : i32
    %c0_i32_1 = arith.constant 0 : i32
    return %arg1, %c0_i32, %c0_i32_0 : i32, i32, i32
  }
  func.func @transform_3(%arg0: i32, %arg1: i32) -> (i32, i32, i32) {
    %c0_i32 = arith.constant 0 : i32
    %c0_i32_0 = arith.constant 0 : i32
    %c0_i32_1 = arith.constant 0 : i32
    return %arg1, %c0_i32, %c0_i32_0 : i32, i32, i32
  }
  func.func @transform_4(%arg0: i32, %arg1: i32) -> (i32, i32, i32) {
    %c0_i32 = arith.constant 0 : i32
    %c0_i32_0 = arith.constant 0 : i32
    %c0_i32_1 = arith.constant 0 : i32
    return %arg1, %c0_i32, %c0_i32_0 : i32, i32, i32
  }
  func.func @transform_5(%arg0: i32, %arg1: i32) -> (i32, i32, i32) {
    %c0_i32 = arith.constant 0 : i32
    %c0_i32_0 = arith.constant 0 : i32
    %c0_i32_1 = arith.constant 0 : i32
    return %arg1, %c0_i32, %c0_i32_0 : i32, i32, i32
  }
  func.func @transform_6(%arg0: i32, %arg1: i32) -> (i32, i32, i32) {
    %c0_i32 = arith.constant 0 : i32
    %c0_i32_0 = arith.constant 0 : i32
    %c0_i32_1 = arith.constant 0 : i32
    return %arg1, %c0_i32, %c0_i32_0 : i32, i32, i32
  }
  func.func @transform_7(%arg0: i32, %arg1: i32) -> (i32, i32, i32) {
    %c0_i32 = arith.constant 0 : i32
    %c0_i32_0 = arith.constant 0 : i32
    %c0_i32_1 = arith.constant 0 : i32
    return %arg1, %c0_i32, %c0_i32_0 : i32, i32, i32
  }
  func.func @transform_8(%arg0: i32, %arg1: i32) -> (i32, i32, i32) {
    %c0_i32 = arith.constant 0 : i32
    %c0_i32_0 = arith.constant 0 : i32
    %c0_i32_1 = arith.constant 0 : i32
    return %arg1, %c0_i32, %c0_i32_0 : i32, i32, i32
  }
  func.func @transform_9(%arg0: i32, %arg1: i32) -> (i32, i32, i32) {
    %c0_i32 = arith.constant 0 : i32
    %c0_i32_0 = arith.constant 0 : i32
    %c0_i32_1 = arith.constant 0 : i32
    return %arg1, %c0_i32, %c0_i32_0 : i32, i32, i32
  }
  func.func @transform_10(%arg0: i32, %arg1: i32) -> (i32, i32, i32) {
    %c0_i32 = arith.constant 0 : i32
    %c0_i32_0 = arith.constant 0 : i32
    %c0_i32_1 = arith.constant 0 : i32
    return %arg1, %c0_i32, %c0_i32_0 : i32, i32, i32
  }
  func.func @transform_11(%arg0: i32, %arg1: i32) -> (i32, i32, i32) {
    %c0_i32 = arith.constant 0 : i32
    %c0_i32_0 = arith.constant 0 : i32
    %c0_i32_1 = arith.constant 0 : i32
    return %arg1, %c0_i32, %c0_i32_0 : i32, i32, i32
  }
  func.func @transform_12(%arg0: i32, %arg1: i32) -> (i32, i32) {
    %c0_i32 = arith.constant 0 : i32
    %c0_i32_0 = arith.constant 0 : i32
    return %arg0, %c0_i32 : i32, i32
  }
}

</mosaic_0001>

<bundles_post_ra>
// kernel: tpu_custom_call.1
= control target key start
LH: loop header
LB: loop body
LE: loop exit
PB: predicated region body
PF: predicated region fallthrough
CT: control target
= control target key end

     0   :  { %s4541_s0 = inlined_call_operand.hbm [shape: f32[16,128], index: 0, kind: input, shape index: {}]   ;;  %s4542_s1 = inlined_call_operand.hbm [shape: f32[2,1,128], index: 1, kind: input, shape index: {}]   ;;  %s4543_s2 = inlined_call_operand.hbm [shape: f32[2,1,128], index: 2, kind: input, shape index: {}]   ;;  %s4544_s3 = inlined_call_operand.hbm [shape: bf16[2,128,384], index: 3, kind: input, shape index: {}]   ;;  %s4545_s4 = inlined_call_operand.hbm [shape: bf16[2,128,128], index: 4, kind: input, shape index: {}]   ;;  %s4546_s5 = inlined_call_operand.hbm [shape: f32[2,1,128], index: 5, kind: input, shape index: {}]   ;;  %s4547_s6 = inlined_call_operand.hbm [shape: f32[2,1,128], index: 6, kind: input, shape index: {}]   ;;  %s4548_s7 = inlined_call_operand.hbm [shape: f32[2,1,128], index: 7, kind: input, shape index: {}]   ;;  %s4549_s8 = inlined_call_operand.hbm [shape: bf16[2,128,512], index: 8, kind: input, shape index: {}]   ;;  %s4550_s9 = inlined_call_operand.vmem [shape: f32[2,1,512], index: 9, kind: input, shape index: {}]   ;;  %s4551_s10 = inlined_call_operand.hbm [shape: bf16[2,512,128], index: 10, kind: input, shape index: {}]   ;;  %s4552_s11 = inlined_call_operand.vmem [shape: f32[2,1,128], index: 11, kind: input, shape index: {}]   ;;  %s4553_s12 = inlined_call_operand.hbm [shape: f32[16,128], index: 12, kind: output, shape index: {}]  }
   0x1   :  { %4561 = sst [smem:[#allocation30_spill]] %s4541_s0 }
   0x2   :  { %4562 = sst [smem:[#allocation31_spill]] %s4542_s1 }
   0x3   :  { %4563 = sst [smem:[#allocation32_spill]] %s4543_s2 }
   0x4   :  { %4564 = sst [smem:[#allocation33_spill]] %s4544_s3 }
   0x5   :  { %4565 = sst [smem:[#allocation34_spill]] %s4545_s4 }
   0x6   :  { %4566 = sst [smem:[#allocation35_spill]] %s4550_s9 }
   0x7   :  { %4567 = sst [smem:[#allocation36_spill]] %s4552_s11 }
   0x8   :  { %4568 = sst [smem:[#allocation37_spill]] %s4553_s12 }
   0x9   :  { %17 = vsyncpa [#allocation3], 0 }
   0xa   :  { %18 = vsyncpa [#allocation6], 0 }
   0xb   :  { %20 = vsyncpa [#allocation6 + $0x1], 0 }
   0xc   :  { %21 = vsyncpa [#allocation9], 0 }
   0xd   :  { %23 = vsyncpa [#allocation9 + $0x1], 0 }
   0xe   :  { %24 = vsyncpa [#allocation12], 0 }
   0xf   :  { %26 = vsyncpa [#allocation12 + $0x1], 0 }
  0x10   :  { %27 = vsyncpa [#allocation15], 0 }
  0x11   :  { %29 = vsyncpa [#allocation15 + $0x1], 0 }
  0x12   :  { %30 = vsyncpa [#allocation18], 0 }
  0x13   :  { %32 = vsyncpa [#allocation18 + $0x1], 0 }
  0x14   :  { %33 = vsyncpa [#allocation4], 0  ;;  %s3910_s21 = smov 0   ;;  %s3912_s22 = smov 0  }
  0x15   :  { %s3914_s23 = smov 0   ;;  %s3916_s24 = smov 0  }
  0x16   :  { %s3918_s25 = smov 0   ;;  %s3920_s26 = smov 0  }
  0x17 LB: > { %4569 = sst [smem:[#allocation27_spill]] %s3815_s23  ;;  %s48_s27 = sadd.s32 1, %s3823_s25  ;;  %s3827_s26 = sphi %s3920_s26, %s39_s26   ;;  %s3823_s25 = sphi %s3918_s25, %s4597_s25   ;;  %s3819_s24 = sphi %s3916_s24, %s4596_s24   ;;  %s3815_s23 = sphi %s3914_s23, %s4592_s23   ;;  %s3811_s22 = sphi %s3912_s22, %s4595_s22   ;;  %s3807_s21 = sphi %s3910_s21, %s4594_s21  }
  0x18   : > { %s84_s28 = sadd.s32 1, %s3815_s23  ;;  %p49_p0 = scmp.ge.s32.totalorder %s48_s27, 2 }
  0x19   : > { %p91_p1 = scmp.ne.s32.totalorder %s3815_s23, %s3811_s22  ;;  %p92_p2 = scmp.eq.s32.totalorder %s3827_s26, 0 }
  0x1a   : > { %s4599_s27 = smov (%p49_p0, %s48_s27), 0  ;;  %p3293_p4 = scmp.lt.s32.totalorder %s3827_s26, 2 }
  0x1b   : > { %4570 = sst [smem:[#allocation28_spill]] %s4599_s27  ;;  %p3947_p3 = por %p92_p2, %p91_p1 }
  0x1c   : > { %s81_s30 = ssub.s32 %s3823_s25, %s4599_s27  ;;  %s3955_s13 = sand.u32 1, %s3827_s26  }
  0x1d   : > { %p82_p5 = scmp.eq.s32.totalorder %s81_s30, 0  ;;  %s3958_s14 = sand.u32 1, %s3815_s23  }
  0x1e   : > { %s4572_s1 = sld [smem:[#allocation31_spill]]  ;;  %s427_s20 = scalar_lea.vmem [#allocation5], %s3958_s14 }
  0x1f   : > { %s3965_s18 = scalar_select %p82_p5, %s3815_s23, %s84_s28  }
  0x20   : > { %s434_s27 = sshll.u32 %s427_s20, 4  ;;  %p3970_p6 = pnand %p3293_p4, %p3947_p3  ;;  %s435_s27 = int_to_ptr.vmem [resolvable:$true] %s434_s27 }
  0x21   : > { %4573 = sst [smem:[#allocation29_spill]] %s3965_s18  ;;  %s3231_s15 = smul.u32 192, %s3958_s14 }
  0x22   : > { %s3232_s16 = smul.u32 192, %s3823_s25  ;;  %s425_s28 = scalar_lea.sflag [#allocation6], %s3955_s13 }
  0x23   : > { %s4575_s3 = sld [smem:[#allocation33_spill]]  ;;  %s462_s18 = scalar_lea.vmem [#allocation8], %s3231_s15 }
  0x24   : > { %s430_s17 = scalar_lea.hbm %s4572_s1, %s3823_s25  ;;  %s470_s23 = sshll.u32 %s462_s18, 4  ;;  %s471_s23 = int_to_ptr.vmem [resolvable:$true] %s470_s23 }
  0x25   : > { %s432_s19 = sshll.u32 %s430_s17, 4  ;;  %s4558_s12 = scalar_lea.sflag [#allocation9], %s3955_s13  ;;  %s433_s19 = int_to_ptr.hbm [resolvable:$true] %s432_s19 }
  0x26   : > { %3267 = dma.hbm_to_vmem [thread:$0]  (!%p3970_p6), %s433_s19, 16, %s435_s27, %s425_s28  }
  0x27   : > { %s3829_s9 = smov 192   ;;  %s3830_s11 = smov 12  }
  0x28   : > { %s508_s19 = scalar_lea.hbm %s4546_s5, %s3823_s25  ;;  %s505_s15 = scalar_lea.vmem [#allocation11], %s3958_s14 }
  0x29   : > { %s467_s20 = scalar_lea.hbm %s4575_s3, %s3232_s16  ;;  %s512_s18 = sshll.u32 %s505_s15, 4  ;;  %s513_s18 = int_to_ptr.vmem [resolvable:$true] %s512_s18 }
  0x2a   : > { %s468_s29 = sshll.u32 %s467_s20, 4  ;;  %s510_s16 = sshll.u32 %s508_s19, 4  ;;  %s469_s29 = int_to_ptr.hbm [resolvable:$true] %s468_s29  ;;  %s511_s16 = int_to_ptr.hbm [resolvable:$true] %s510_s16 }
  0x2b   : > { %3273 = dma.hbm_to_vmem [thread:$0]  (!%p3970_p6), %s469_s29, 3072, %s471_s23, %s4558_s12, %s3829_s9, %s3829_s9, %s3830_s11  }
  0x2c   : > { %s4557_s17 = scalar_lea.sflag [#allocation12], %s3955_s13  ;;  %s542_s23 = scalar_lea.hbm %s4548_s7, %s3823_s25 }
  0x2d   : > { %3279 = dma.hbm_to_vmem [thread:$0]  (!%p3970_p6), %s511_s16, 16, %s513_s18, %s4557_s17  }
  0x2e   : > { %s544_s20 = sshll.u32 %s542_s23, 4  ;;  %s539_s29 = scalar_lea.vmem [#allocation14], %s3958_s14  ;;  %s545_s20 = int_to_ptr.hbm [resolvable:$true] %s544_s20 }
  0x2f   : > { %s546_s27 = sshll.u32 %s539_s29, 4  ;;  %s4556_s1 = scalar_lea.sflag [#allocation15], %s3955_s13  ;;  %s547_s27 = int_to_ptr.vmem [resolvable:$true] %s546_s27 }
  0x30   : > { %3285 = dma.hbm_to_vmem [thread:$0]  (!%p3970_p6), %s545_s20, 16, %s547_s27, %s4556_s1  }
  0x31   : > { %s4010_s19 = sadd.s32 4294967295, %s3827_s26   ;;  %p97_p7 = scmp.ne.s32.totalorder %s3811_s22, %s3807_s21 }
  0x32   : > { %p98_p8 = scmp.eq.s32.totalorder %s4010_s19, 0  ;;  %p2700_p9 = scmp.ge.s32.totalorder %s3827_s26, 1 }
  0x33   : > { %p394_p10 = scmp.lt.s32.totalorder %s3827_s26, 3  ;;  %s4577_s0 = sld [smem:[#allocation30_spill]] }
  0x34   : > { %p4019_p11 = por %p98_p8, %p97_p7  ;;  %s3831_s21 = smov [#allocation2]  }
  0x35   : > { %p4026_p12 = pnand %p2700_p9, %p394_p10  ;;  %s410_s23 = sshll.u32 %s3831_s21, 4  ;;  %s411_s23 = int_to_ptr.vmem [resolvable:$true] %s410_s23 }
  0x36   : > { %s4579_s2 = sld [smem:[#allocation32_spill]]  ;;  %s444_s18 = scalar_lea.vmem [#allocation7], %s3958_s14 }
  0x37   : > { %p3260_p13 = pneg %p4026_p12  ;;  %s451_s16 = sshll.u32 %s444_s18, 4  ;;  %s452_s16 = int_to_ptr.vmem [resolvable:$true] %s451_s16 }
  0x38   : > { %s3832_s17 = smov 128   ;;  %s3833_s12 = smov 8  }
  0x39   : > { %s408_s9 = sshll.u32 %s4577_s0, 4  ;;  %p3261_p0 = pnand %p3260_p13, %p98_p8  ;;  %s409_s9 = int_to_ptr.hbm [resolvable:$true] %s408_s9 }
  0x3a   : > { %s2704_s21 = sshll.u32 %s3958_s14, 6  ;;  %s3132_s0 = sshll.u32 %s3823_s25, 6 }
  0x3b   : > { %3263 = dma.hbm_to_vmem [thread:$0]  (!%p3261_p0), %s409_s9, 256, %s411_s23, [#allocation3], %s3832_s17, %s3832_s17, %s3833_s12  }
  0x3c   : > { %s447_s27 = scalar_lea.hbm %s4579_s2, %s3823_s25  ;;  %s4580_s4 = sld [smem:[#allocation34_spill]] }
  0x3d   : > { %s449_s1 = sshll.u32 %s447_s27, 4  ;;  %s484_s18 = scalar_lea.vmem [#allocation10], %s2704_s21  ;;  %s450_s1 = int_to_ptr.hbm [resolvable:$true] %s449_s1 }
  0x3e   : > { %3270 = dma.hbm_to_vmem [thread:$0]  (!%p3970_p6), %s450_s1, 16, %s452_s16, %s425_s28  }
  0x3f   : > { %s492_s2 = sshll.u32 %s484_s18, 4  ;;  %s4559_s12 = smov 64   ;;  %s493_s2 = int_to_ptr.vmem [resolvable:$true] %s492_s2 }
  0x40   : > { %s4560_s17 = smov 4   ;;  %s4581_s28 = scalar_lea.sflag [#allocation9], %s3955_s13 }
  0x41   : > { %s525_s9 = scalar_lea.hbm %s4547_s6, %s3823_s25  ;;  %s522_s23 = scalar_lea.vmem [#allocation13], %s3958_s14 }
  0x42   : > { %s489_s29 = scalar_lea.hbm %s4580_s4, %s3132_s0  ;;  %s527_s0 = sshll.u32 %s525_s9, 4  ;;  %s528_s0 = int_to_ptr.hbm [resolvable:$true] %s527_s0 }
  0x43   : > { %s490_s27 = sshll.u32 %s489_s29, 4  ;;  %s529_s16 = sshll.u32 %s522_s23, 4  ;;  %s491_s27 = int_to_ptr.hbm [resolvable:$true] %s490_s27  ;;  %s530_s16 = int_to_ptr.vmem [resolvable:$true] %s529_s16 }
  0x44   : > { %3276 = dma.hbm_to_vmem [thread:$0]  (!%p3970_p6), %s491_s27, 1024, %s493_s2, %s4581_s28, %s4559_s12, %s4559_s12, %s4560_s17  }
  0x45   : > { %s4582_s21 = scalar_lea.sflag [#allocation12], %s3955_s13  ;;  %s2707_s20 = sshll.u32 %s3958_s14, 8 }
  0x46   : > { %3282 = dma.hbm_to_vmem [thread:$0]  (!%p3970_p6), %s528_s0, 16, %s530_s16, %s4582_s21  }
  0x47   : > { %s3133_s29 = sshll.u32 %s3823_s25, 8  ;;  %s557_s28 = scalar_lea.vmem [#allocation16], %s2707_s20 }
  0x48   : > { %s562_s2 = scalar_lea.hbm %s4549_s8, %s3133_s29  ;;  %s565_s1 = sshll.u32 %s557_s28, 4  ;;  %s566_s1 = int_to_ptr.vmem [resolvable:$true] %s565_s1 }
  0x49   : > { %s563_s27 = sshll.u32 %s562_s2, 4  ;;  %s3836_s3 = smov 256   ;;  %s564_s27 = int_to_ptr.hbm [resolvable:$true] %s563_s27 }
  0x4a   : > { %s3837_s9 = smov 16   ;;  %s4583_s23 = scalar_lea.sflag [#allocation15], %s3955_s13 }
  0x4b   : > { %3288 = dma.hbm_to_vmem [thread:$0]  (!%p3970_p6), %s564_s27, 4096, %s566_s1, %s4583_s23, %s3836_s3, %s3836_s3, %s3837_s9  }
  0x4c   : > { %s591_s16 = scalar_lea.hbm %s4551_s10, %s3133_s29  ;;  %s586_s21 = scalar_lea.vmem [#allocation17], %s2707_s20 }
  0x4d   : > { %s594_s17 = sshll.u32 %s586_s21, 4  ;;  %s592_s4 = sshll.u32 %s591_s16, 4  ;;  %s595_s17 = int_to_ptr.vmem [resolvable:$true] %s594_s17  ;;  %s593_s4 = int_to_ptr.hbm [resolvable:$true] %s592_s4 }
  0x4e   : > { %s583_s18 = scalar_lea.sflag [#allocation18], %s3958_s14  ;;  %s4584_s2 = smov 4  }
  0x4f   : > { %s4585_s28 = smov 64   ;;  %612 = sbr.rel (%p4026_p12) target bundleno = 3268 (0xcc4), region = 68 }
  0x50   : > { %3291 = dma.hbm_to_vmem [thread:$0]  (!%p3970_p6), %s593_s4, 4096, %s595_s17, %s583_s18, %s4585_s28, %s4585_s28, %s4584_s2  }
  0x54   : > { %3778 = dma.done.wait (%p98_p8), [#allocation3], 256  }
  0x55   : > { %3780 = vsyncadd (%p98_p8), [#allocation3], 4294967040  ;;  %s619_s13 = sand.u32 1, %s4010_s19   ;;  %s4090_s12 = sand.u32 1, %s3811_s22  }
  0x56   : > { %s620_s14 = scalar_lea.sflag [#allocation6], %s619_s13  ;;  %s622_s30 = scalar_lea.vmem [#allocation5], %s4090_s12 }
  0x57   : > { %3782 = dma.done.wait (%p4019_p11), %s620_s14, 32  }
  0x58   : > { %3784 = vsyncadd (%p4019_p11), %s620_s14, 4294967264  ;;  %s3233_s11 = smul.u32 192, %s4090_s12  ;;  %s631_s17 = scalar_lea.vmem [#allocation7], %s4090_s12 }
  0x59   : > { %s638_s20 = scalar_lea.sflag [#allocation9], %s619_s13 }
  0x5a   : > { %s4099_s29 = scalar_lea.vmem [#allocation8], %s3233_s11 }
  0x5b   : > { %3786 = dma.done.wait (%p4019_p11), %s638_s20, 4096  }
  0x5c   : > { %3788 = vsyncadd (%p4019_p11), %s638_s20, 4294963200  ;;  %s2715_s27 = sshll.u32 %s4090_s12, 6  ;;  %s658_s3 = scalar_lea.sflag [#allocation12], %s619_s13 }
  0x5d   : > { %s4106_s1 = scalar_lea.vmem [#allocation10], %s2715_s27  ;;  %s660_s9 = scalar_lea.vmem [#allocation11], %s4090_s12 }
  0x5e   : > { %3790 = dma.done.wait (%p4019_p11), %s658_s3, 32  }
  0x5f   : > { %3792 = vsyncadd (%p4019_p11), %s658_s3, 4294967264  ;;  %s669_s23 = scalar_lea.vmem [#allocation13], %s4090_s12  ;;  %s676_s0 = scalar_lea.sflag [#allocation15], %s619_s13 }
  0x60   : > { %3794 = dma.done.wait (%p4019_p11), %s676_s0, 4112  }
  0x61   : > { %3796 = vsyncadd (%p4019_p11), %s676_s0, 4294963184  ;;  %s2716_s21 = sshll.u32 %s4090_s12, 8  ;;  %s695_s18 = scalar_lea.sflag [#allocation18], %s4090_s12 }
  0x62   : > { %s4120_s4 = scalar_lea.vmem [#allocation16], %s2716_s21  ;;  %s4123_s2 = scalar_lea.vmem [#allocation17], %s2716_s21 }
  0x63   : > { %3798 = dma.done.wait (%p4019_p11), %s695_s18, 4096  }
  0x64   : > { %3800 = vsyncadd (%p4019_p11), %s695_s18, 4294963200  ;;  %p778_p1 = scmp.lt.s32.totalorder %s3819_s24, 1  ;;  %s4586_s20 = sld [smem:[#allocation36_spill]] }
  0x65   : > { %s4587_s21 = sld [smem:[#allocation35_spill]]  ;;  %p2719_p2 = scmp.ne.s32.totalorder %s3819_s24, 0 }
  0x66   : > { %s4131_s28 = scalar_select %p778_p1, %s3819_s24, 1 }
  0x67   : > { %790 = sbr.rel (%p2719_p2) target bundleno = 111 (0x6f), region = 112 }
  0x68   : > { %s2718_s13 = sshll.u32 %s4131_s28, 2 }
  0x6a   : > { %s784_s27 = scalar_lea.vmem %s4586_s20, %s4131_s28 }
  0x6b   : > { %s4141_s16 = scalar_lea.vmem %s4587_s21, %s2718_s13 }
  0x6c   : > { %v791_v0 = vld [vmem:[#allocation2] sm:$0xff]  ;;  %v792_v1 = vld [vmem:[#allocation2 + $0x8] sm:$0xff] }
  0x6d   : > { %793 = vst [vmem:[#allocation19] sm:$0xff] %v791_v0 }
  0x6e   : > { %794 = vst [vmem:[#allocation19 + $0x8] sm:$0xff] %v792_v1 }
  0x6f PF: > { %v3838_v4 = vmov 128.0   ;;  %v2806_v19 = vld [vmem:[%s4099_s29 + $0xa8] sm:$0xf]  ;;  %v3157_v20 = vld [vmem:[%s4099_s29 + $0xb0] sm:$0xf0]  ;;  %vm1082_vm7 = vcmask 261120  }
  0x70   : > { %3367 = vrcp.f32 %v3838_v4  ;;  %v3156_v21 = vld [vmem:[%s4099_s29 + $0xac] sm:$0xf]  ;;  %v2807_v22 = vor.u32 %v3157_v20, %v2806_v19  ;;  %v2808_v23 = vld [vmem:[%s4099_s29 + $0xb4] sm:$0xf0]  ;;  %v2814_v24 = vld [vmem:[%s4099_s29 + $0xb0] sm:$0xf] }
  0x71   : > { %v3158_v25 = vld [vmem:[%s4099_s29 + $0xb8] sm:$0xf0]  ;;  %v2811_v26 = vor.u32 %v3156_v21, %v2808_v23  ;;  %v2794_v28 = vld [vmem:[%s4099_s29 + $0x90] sm:$0xf]  ;;  %v3153_v30 = vld [vmem:[%s4099_s29 + $0x94] sm:$0xf] }
  0x72   : > { %v2815_v27 = vor.u32 %v3158_v25, %v2814_v24  ;;  %1017 = vmatpush.bf16.msra.mxu0 %v2807_v22  ;;  %v3154_v29 = vld [vmem:[%s4099_s29 + $0x98] sm:$0xf0]  ;;  %v2796_v32 = vld [vmem:[%s4099_s29 + $0x9c] sm:$0xf0]  ;;  %v2802_v33 = vld [vmem:[%s4099_s29 + $0x98] sm:$0xf] }
  0x73   : > { %1031 = vmatpush.bf16.msra.mxu1 %v2811_v26  ;;  %v2795_v31 = vor.u32 %v3154_v29, %v2794_v28  ;;  %v3155_v34 = vld [vmem:[%s4099_s29 + $0xa0] sm:$0xf0]  ;;  %v2799_v35 = vor.u32 %v3153_v30, %v2796_v32  ;;  %v2782_v37 = vld [vmem:[%s4099_s29 + $0x78] sm:$0xf]  ;;  %v3150_v39 = vld [vmem:[%s4099_s29 + $0x7c] sm:$0xf] }
  0x74   : > { %v4144_v2 = vld [vmem:[#allocation19] sm:$0xff]  ;;  %1045 = vmatpush.bf16.msra.mxu2 %v2815_v27  ;;  %v2803_v36 = vor.u32 %v3155_v34, %v2802_v33  ;;  %v2790_v42 = vld [vmem:[%s4099_s29 + $0x80] sm:$0xf]  ;;  %v2772_v50 = vld [vmem:[%s4099_s29 + $0x6c] sm:$0xf0]  ;;  %s3839_s24 = smov 96  }
  0x75   : > { %799 = vadd.xlane.f32.xlu0 %v4144_v2  ;;  %v4147_v3 = vld [vmem:[#allocation19 + $0x8] sm:$0xff]  ;;  %v3151_v38 = vld [vmem:[%s4099_s29 + $0x80] sm:$0xf0]  ;;  %v2784_v41 = vld [vmem:[%s4099_s29 + $0x84] sm:$0xf0]  ;;  %vm1118_vm8 = vcmask 1043456  }
  0x76   : > { %v3368_v5 = vpop.eup %3367  ;;  %1018 = vmatpush.bf16.msra.mxu0 %v2795_v31  ;;  %v2783_v40 = vor.u32 %v3151_v38, %v2782_v37  ;;  %v3152_v43 = vld [vmem:[%s4099_s29 + $0x88] sm:$0xf0]  ;;  %v2787_v44 = vor.u32 %v3150_v39, %v2784_v41  ;;  %v2770_v46 = vld [vmem:[%s4099_s29 + $0x60] sm:$0xf]  ;;  %v3147_v48 = vld [vmem:[%s4099_s29 + $0x64] sm:$0xf] }
  0x77   : > { %v804_v6 = vmul.f32 128.0, %v3368_v5  ;;  %vm808_vm0 = vweird.f32 %v3368_v5  ;;  %1032 = vmatpush.bf16.msra.mxu1 %v2799_v35  ;;  %v2791_v45 = vor.u32 %v3152_v43, %v2790_v42  ;;  %v3148_v47 = vld [vmem:[%s4099_s29 + $0x68] sm:$0xf0]  ;;  %v2778_v51 = vld [vmem:[%s4099_s29 + $0x68] sm:$0xf]  ;;  %v2775_v53 = vor.u32 %v3147_v48, %v2772_v50  ;;  %s3840_s15 = smov 64  }
  0x78   : > { %1046 = vmatpush.bf16.msra.mxu2 %v2803_v36  ;;  %v2771_v49 = vor.u32 %v3148_v47, %v2770_v46  ;;  %v3149_v52 = vld [vmem:[%s4099_s29 + $0x70] sm:$0xf0]  ;;  %v2758_v55 = vld [vmem:[%s4099_s29 + $0x48] sm:$0xf]  ;;  %v3144_v57 = vld [vmem:[%s4099_s29 + $0x4c] sm:$0xf] }
  0x79   : > { %v805_v7 = vsub.f32 1.0, %v804_v6  ;;  %v2779_v54 = vor.u32 %v3149_v52, %v2778_v51  ;;  %v3145_v56 = vld [vmem:[%s4099_s29 + $0x50] sm:$0xf0]  ;;  %v2760_v59 = vld [vmem:[%s4099_s29 + $0x54] sm:$0xf0]  ;;  %vm1102_vm9 = vcmask 64512  }
  0x7a   : > { %1019 = vmatpush.bf16.msra.mxu0 %v2783_v40  ;;  %v2759_v58 = vor.u32 %v3145_v56, %v2758_v55  ;;  %v2766_v60 = vld [vmem:[%s4099_s29 + $0x50] sm:$0xf]  ;;  %v3146_v61 = vld [vmem:[%s4099_s29 + $0x58] sm:$0xf0]  ;;  %v2763_v62 = vor.u32 %v3144_v57, %v2760_v59  ;;  %v3141_v4 = vld [vmem:[%s4099_s29 + $0x34] sm:$0xf] }
  0x7b   : > { %v806_v8 = vmul.f32 %v3368_v5, %v805_v7  ;;  %1033 = vmatpush.bf16.msra.mxu1 %v2787_v44  ;;  %v2767_v63 = vor.u32 %v3146_v61, %v2766_v60  ;;  %v2746_v0 = vld [vmem:[%s4099_s29 + $0x30] sm:$0xf]  ;;  %v3142_v1 = vld [vmem:[%s4099_s29 + $0x38] sm:$0xf0]  ;;  %v2748_v6 = vld [vmem:[%s4099_s29 + $0x3c] sm:$0xf0] }
  0x7c   : > { %1047 = vmatpush.bf16.msra.mxu2 %v2791_v45  ;;  %v2754_v7 = vld [vmem:[%s4099_s29 + $0x38] sm:$0xf]  ;;  %v2742_v19 = vld [vmem:[%s4099_s29 + $0x20] sm:$0xf]  ;;  %v3140_v20 = vld [vmem:[%s4099_s29 + $0x28] sm:$0xf0] }
  0x7d   : > { %801 = vadd.xlane.f32.xlu0 %v4147_v3  ;;  %v807_v9 = vadd.f32 %v3368_v5, %v806_v8  ;;  %v3143_v8 = vld [vmem:[%s4099_s29 + $0x40] sm:$0xf0]  ;;  %v2743_v22 = vor.u32 %v3140_v20, %v2742_v19  ;;  %v2722_v23 = vld [vmem:[%s4099_s29] sm:$0xf]  ;;  %v3136_v24 = vld [vmem:[%s4099_s29 + $0x8] sm:$0xf0] }
  0x7e   : > { %1020 = vmatpush.bf16.msra.mxu0 %v2771_v49  ;;  %v3135_v25 = vld [vmem:[%s4099_s29 + $0x4] sm:$0xf]  ;;  %v2723_v27 = vor.u32 %v3136_v24, %v2722_v23  ;;  %v2724_v28 = vld [vmem:[%s4099_s29 + $0xc] sm:$0xf0]  ;;  %v2730_v29 = vld [vmem:[%s4099_s29 + $0x8] sm:$0xf] }
  0x7f   : > { %v4150_v10 = vsel %vm808_vm0, %v3368_v5, %v807_v9  ;;  %1034 = vmatpush.bf16.msra.mxu1 %v2775_v53  ;;  %v2747_v5 = vor.u32 %v3142_v1, %v2746_v0  ;;  %v2751_v9 = vor.u32 %v3141_v4, %v2748_v6  ;;  %v3137_v30 = vld [vmem:[%s4099_s29 + $0x10] sm:$0xf0]  ;;  %v2727_v32 = vor.u32 %v3135_v25, %v2724_v28  ;;  %v3361_v51 = vld [vmem:[%s622_s30] ss:$0 sm:$0xff]  ;;  %s3841_s30 = smov 32   ;;  %s4590_s18 = sld [smem:[#allocation37_spill]] }
  0x80   : > { %1048 = vmatpush.bf16.msra.mxu2 %v2779_v54  ;;  %v2731_v33 = vor.u32 %v3137_v30, %v2730_v29  ;;  %v3362_v56 = vld [vmem:[%s631_s17] ss:$0 sm:$0xff]  ;;  %v4244_v30 = vld [vmem:[%s4106_s1] sm:$0xff]  ;;  %s4588_s17 = scalar_lea.vmem [#allocation14], %s4090_s12  ;;  %p3295_p3 = scmp.eq.s32.totalorder %s4010_s19, 1 }
  0x81   : > { %s3843_s28 = smov 128   ;;  %s3844_s13 = smov 8  }
  0x82   : > { %1021 = vmatpush.bf16.msra.mxu0 %v2759_v58 }
  0x83   : > { %1035 = vmatpush.bf16.msra.mxu1 %v2763_v62 }
  0x84   : > { %1049 = vmatpush.bf16.msra.mxu2 %v2767_v63 }
  0x86   : > { %1022 = vmatpush.bf16.msra.mxu0 %v2747_v5 }
  0x87   : > { %1036 = vmatpush.bf16.msra.mxu1 %v2751_v9 }
  0xe8   : > { %v800_v11 = vpop.xlane.xlu0 %799 }
  0xe9   : > { %v810_v12 = vmul.f32 %v4150_v10, %v800_v11  ;;  %v2755_v11 = vor.u32 %v3143_v8, %v2754_v7 }
  0xeb   : > { %v4154_v13 = vsub.f32 %v4144_v2, %v810_v12  ;;  %1050 = vmatpush.bf16.msra.mxu2 %v2755_v11  ;;  %v2734_v12 = vld [vmem:[%s4099_s29 + $0x18] sm:$0xf] }
  0xed   : > { %v814_v14 = vmul.f32 %v4154_v13, %v4154_v13 }
  0xef   : > { %816 = vadd.xlane.f32.xlu1 %v814_v14  ;;  %v3139_v14 = vld [vmem:[%s4099_s29 + $0x20] sm:$0xf0]  ;;  %1051 = vmatpush.bf16.msra.mxu2 %v2743_v22 }
  0xf0   : > { %v802_v15 = vpop.xlane.xlu0 %801 }
  0xf1   : > { %v811_v16 = vmul.f32 %v4150_v10, %v802_v15  ;;  %v3138_v15 = vld [vmem:[%s4099_s29 + $0x1c] sm:$0xf] }
  0xf3   : > { %v4160_v17 = vsub.f32 %v4147_v3, %v811_v16  ;;  %v2735_v16 = vor.u32 %v3139_v14, %v2734_v12  ;;  %1052 = vmatpush.bf16.msra.mxu2 %v2731_v33 }
  0xf5   : > { %v815_v18 = vmul.f32 %v4160_v17, %v4160_v17  ;;  %1023 = vmatpush.bf16.msra.mxu0 %v2735_v16 }
  0xf7   : > { %818 = vadd.xlane.f32.xlu1 %v815_v18  ;;  %v2736_v18 = vld [vmem:[%s4099_s29 + $0x24] sm:$0xf0] }
  0xf8   : > { %v2739_v21 = vor.u32 %v3138_v15, %v2736_v18 }
  0xf9   : > { %1024 = vmatpush.bf16.msra.mxu0 %v2723_v27  ;;  %v4238_v27 = vld [vmem:[%s4106_s1 + $0x8] sm:$0xff] }
  0xfa   : > { %1037 = vmatpush.bf16.msra.mxu1 %v2739_v21  ;;  %1247 = vmatpush.bf16.msrb.mxu2 %v4238_v27 }
  0xfe   : > { %1038 = vmatpush.bf16.msra.mxu1 %v2727_v32  ;;  %1248 = vmatpush.bf16.msrb.mxu2 %v4244_v30 }
 0x162   : > { %v817_v26 = vpop.xlane.xlu1 %816 }
 0x163   : > { %v820_v31 = vmul.f32 %v817_v26, %v4150_v10 }
 0x165   : > { %v822_v34 = vadd.f32 1e-05, %v820_v31 }
 0x167   : > { %3369 = vrsqrt.f32 %v822_v34  ;;  %vm830_vm2 = vweird.f32 %v822_v34 }
 0x16a   : > { %v819_v35 = vpop.xlane.xlu1 %818 }
 0x16b   : > { %v821_v36 = vmul.f32 %v819_v35, %v4150_v10 }
 0x16d   : > { %v3370_v37 = vpop.eup %3369  ;;  %v823_v38 = vadd.f32 1e-05, %v821_v36 }
 0x16e   : > { %v825_v39 = vmul.f32 %v3370_v37, %v822_v34  ;;  %vm831_vm1 = vweird.f32 %v3370_v37 }
 0x16f   : > { %3371 = vrsqrt.f32 %v823_v38  ;;  %vm832_vm3 = vmor %vm830_vm2, %vm831_vm1  ;;  %vm840_vm5 = vweird.f32 %v823_v38 }
 0x170   : > { %v826_v40 = vmul.f32 %v3370_v37, %v825_v39 }
 0x172   : > { %v827_v41 = vmul.f32 0.5, %v826_v40 }
 0x174   : > { %v828_v42 = vsub.f32 1.5, %v827_v41 }
 0x175   : > { %v3372_v43 = vpop.eup %3371 }
 0x176   : > { %v829_v44 = vmul.f32 %v3370_v37, %v828_v42  ;;  %v835_v45 = vmul.f32 %v3372_v43, %v823_v38  ;;  %vm841_vm4 = vweird.f32 %v3372_v43 }
 0x177   : > { %vm842_vm6 = vmor %vm840_vm5, %vm841_vm4 }
 0x178   : > { %v836_v46 = vmul.f32 %v3372_v43, %v835_v45  ;;  %v833_v47 = vsel %vm832_vm3, %v3370_v37, %v829_v44 }
 0x179   : > { %v844_v50 = vmul.f32 %v833_v47, %v4154_v13 }
 0x17a   : > { %v837_v48 = vmul.f32 0.5, %v836_v46 }
 0x17b   : > { %v849_v55 = vmul.f32 %v3361_v51, %v844_v50 }
 0x17c   : > { %v838_v49 = vsub.f32 1.5, %v837_v48 }
 0x17d   : > { %v854_v58 = vadd.f32 %v3362_v56, %v849_v55 }
 0x17e   : > { %v839_v52 = vmul.f32 %v3372_v43, %v838_v49 }
 0x180   : > { %v843_v53 = vsel %vm842_vm6, %v3372_v43, %v839_v52 }
 0x181   : > { %v845_v54 = vmul.f32 %v843_v53, %v4160_v17 }
 0x183   : > { %v850_v57 = vmul.f32 %v3361_v51, %v845_v54 }
 0x185   : > { %v855_v59 = vadd.f32 %v3362_v56, %v850_v57 }
 0x187   : > { %v856_v60 = vpack.c.bf16 %v855_v59, %v854_v58 }
 0x189   : > { %1025 = vmatmul.bf16.vlgmr.msra.gmra.mxu0 %v856_v60  ;;  %1039 = vmatmul.bf16.vlgmr.msra.gmra.mxu1 %v856_v60 }
 0x18a   : > { %1053 = vmatmul.bf16.vlgmr.msra.gmra.mxu2 %v856_v60 }
 0x206   : > { %v1026_v61 = vpop.f32.mrf.mxu0  ;;  %v1040_v13 = vpop.f32.mrf.mxu1 }
 0x207   : > { %v1059_v62 = vpack.c.bf16 %v1040_v13, %v1026_v61  ;;  %v3162_v13 = vld [vmem:[%s4106_s1 + $0x18] sm:$0xff] }
 0x208   : > { %1219 = vmatpush.bf16.msrb.mxu1 %v3162_v13 }
 0x209   : > { %v1080_v63 = vunpack.c.h.b16 %v1059_v62  ;;  %v1136_v0 = vunpack.c.l.b16 %v1059_v62 }
 0x20b   : > { %v4220_v1 = vpack.c.b16 %v1080_v63, %v1080_v63  ;;  %v1137_v4 = vpack.c.b16 %v1136_v0, %v1136_v0  ;;  %v3161_v63 = vld [vmem:[%s4106_s1 + $0x10] sm:$0xff] }
 0x20c   : > { %1220 = vmatpush.bf16.msrb.mxu1 %v3161_v63 }
 0x20d   : > { %v1054_v17 = vpop.f32.mrf.mxu2  ;;  %1138 = vrot.lane.b32.xlu1 %v1137_v4, %s3839_s24  ;;  %1140 = vrot.lane.b32.xlu0 %v4220_v1, %s3839_s24  ;;  %v1087_v5 = vsel %vm1082_vm7, %v4220_v1, 0 }
 0x20e   : > { %v1060_v6 = vpack.c.bf16 %v1054_v17, %v1054_v17  ;;  %1096 = vmatpush.bf16.xpose.msra.mxu3 %v1087_v5 }
 0x210   : > { %v1120_v7 = vsel %vm1118_vm8, %v1060_v6, 0  ;;  %v1174_v39 = vunpack.c.l.b16 %v1060_v6 }
 0x212   : > { %v4250_v40 = vpack.c.b16 %v1174_v39, %v1174_v39 }
 0x215   : > { %1254 = vrot.lane.b32.xlu0 %v1137_v4, %s3840_s15  ;;  %2816 = vmatmul.msk.bf16.vlgmr.msra.gmra.mxu3 %vm1082_vm7, %v1059_v62  ;;  %v1056_v42 = vpop.f32.mrf.mxu2 }
 0x216   : > { %1129 = vmatpush.bf16.msrb.mxu3 %v1120_v7  ;;  %v4270_v6 = vpack.c.bf16 %v1056_v42, %v1056_v42 }
 0x27f   : > { %v1141_v8 = vpop.permute.xlu0 %1140  ;;  %v1139_v28 = vpop.permute.xlu1 %1138 }
 0x280   : > { %v1146_v9 = vsel %vm1082_vm7, %v1141_v8, 0 }
 0x281   : > { %1155 = vmatpush.bf16.xpose.msra.mxu3 %v1146_v9  ;;  %v1464_v9 = vsel %vm1118_vm8, %v4270_v6, 0 }
 0x287   : > { %v1255_v29 = vpop.permute.xlu0 %1254 }
 0x298   : > { %v1098_v11 = vpop.f32.mrf.mxu3 }
 0x299   : > { %v1103_v12 = vsel %vm1102_vm9, %v1098_v11, -inf }
 0x29a   : > { %1104 = vmax.xlane.f32.xlu2 %v1103_v12  ;;  %v3163_v12 = vld [vmem:[%s4106_s1 + $0x20] sm:$0xff] }
 0x2a0   : > { %v1100_v14 = vpop.f32.mrf.mxu3 }
 0x2a1   : > { %v1028_v14 = vpop.f32.mrf.mxu0 }
 0x30d   : > { %v1105_v15 = vpop.xlane.xlu2 %1104 }
 0x30e   : > { %v1106_v16 = vsub.f32 %v1098_v11, %v1105_v15  ;;  %v1042_v15 = vpop.f32.mrf.mxu1 }
 0x310   : > { %v1107_v18 = vmul.f32 1.442695, %v1106_v16  ;;  %v1061_v16 = vpack.c.bf16 %v1042_v15, %v1028_v14 }
 0x312   : > { %3373 = vpow2.f32 %v1107_v18  ;;  %v1427_v18 = vunpack.c.h.b16 %v1061_v16 }
 0x318   : > { %v3374_v19 = vpop.eup %3373 }
 0x319   : > { %v1109_v20 = vsel %vm1102_vm9, %v3374_v19, 0.0 }
 0x31a   : > { %1110 = vadd.xlane.f32.xlu2 %v1109_v20 }
 0x332   : > { %1256 = vrot.lane.b32.xlu2 %v4220_v1, %s3840_s15 }
 0x38d   : > { %v1111_v21 = vpop.xlane.xlu2 %1110 }
 0x38e   : > { %3375 = vrcp.f32 %v1111_v21 }
 0x394   : > { %v3376_v22 = vpop.eup %3375 }
 0x395   : > { %v1113_v23 = vmul.f32 %v3376_v22, %v3374_v19  ;;  %v1257_v24 = vpop.permute.xlu2 %1256  ;;  %v1428_v19 = vpack.c.b16 %v1427_v18, %v1427_v18 }
 0x396   : > { %v1262_v26 = vsel %vm1082_vm7, %v1257_v24, 0 }
 0x397   : > { %v1114_v25 = vpack.c.bf16 %v1113_v23, %v1113_v23  ;;  %v1433_v22 = vsel %vm1082_vm7, %v1428_v19, 0 }
 0x399   : > { %2817 = vmatmul.msk.bf16.vlgmr.msrb.gmra.mxu3 %vm1102_vm9, %v1114_v25 }
 0x39a   : > { %1271 = vmatpush.bf16.xpose.msrb.mxu3 %v1262_v26 }
 0x3a9   : > { %2818 = vmatmul.msk.bf16.vlgmr.msra.gmra.mxu3 %vm1082_vm7, %v1139_v28 }
 0x3b9   : > { %2838 = vmatmul.msk.bf16.vlgmr.msrb.gmra.mxu3 %vm1082_vm7, %v1255_v29 }
 0x41c   : > { %v1131_v31 = vpop.f32.mrf.mxu3 }
 0x41d   : > { %v1135_v32 = vpack.c.bf16 %v1131_v31, %v1131_v31 }
 0x41f   : > { %2837 = vmatmul.msk.bf16.vlgmr.msrb.gmra.mxu2 %vm1082_vm7, %v1135_v32 }
 0x424   : > { %v1133_v33 = vpop.f32.mrf.mxu3 }
 0x42c   : > { %v1157_v34 = vpop.f32.mrf.mxu3 }
 0x42d   : > { %v1161_v35 = vsel %vm1102_vm9, %v1157_v34, -inf }
 0x42e   : > { %1162 = vmax.xlane.f32.xlu2 %v1161_v35 }
 0x434   : > { %v1159_v36 = vpop.f32.mrf.mxu3 }
 0x43c   : > { %v1273_v37 = vpop.f32.mrf.mxu3 }
 0x43d   : > { %v1277_v38 = vsel %vm1102_vm9, %v1273_v37, -inf }
 0x43e   : > { %1278 = vmax.xlane.f32.xlu1 %v1277_v38 }
 0x444   : > { %v1275_v41 = vpop.f32.mrf.mxu3 }
 0x446   : > { %1176 = vrot.lane.b32.xlu2 %v4250_v40, %s3839_s24 }
 0x44e   : > { %1340 = vrot.lane.b32.xlu2 %v1137_v4, %s3841_s30  ;;  %v3164_v4 = vld [vmem:[%s4106_s1 + $0x28] sm:$0xff] }
 0x44f   : > { %1332 = vmatpush.bf16.msra.mxu1 %v3164_v4 }
 0x453   : > { %1333 = vmatpush.bf16.msra.mxu1 %v3163_v12 }
 0x4a1   : > { %v1163_v43 = vpop.xlane.xlu2 %1162 }
 0x4a2   : > { %v1164_v44 = vsub.f32 %v1157_v34, %v1163_v43  ;;  %v4255_v45 = vpop.f32.mrf.mxu2 }
 0x4a4   : > { %v1165_v46 = vmul.f32 1.442695, %v1164_v44 }
 0x4a6   : > { %3377 = vpow2.f32 %v1165_v46 }
 0x4a9   : > { %v1177_v47 = vpop.permute.xlu2 %1176 }
 0x4aa   : > { %v1252_v48 = vpop.f32.mrf.mxu2  ;;  %v1182_v49 = vsel %vm1118_vm8, %v1177_v47, 0 }
 0x4ab   : > { %1191 = vmatpush.bf16.msrb.mxu0 %v1182_v49 }
 0x4ac   : > { %v3378_v50 = vpop.eup %3377 }
 0x4ad   : > { %v1167_v51 = vsel %vm1102_vm9, %v3378_v50, 0.0 }
 0x4ae   : > { %1168 = vadd.xlane.f32.xlu0 %v1167_v51 }
 0x4b1   : > { %v1279_v52 = vpop.xlane.xlu1 %1278  ;;  %v1341_v11 = vpop.permute.xlu2 %1340 }
 0x4b2   : > { %v1280_v53 = vsub.f32 %v1273_v37, %v1279_v52 }
 0x4b4   : > { %v1281_v54 = vmul.f32 1.442695, %v1280_v53 }
 0x4b6   : > { %3379 = vpow2.f32 %v1281_v54 }
 0x4bc   : > { %v3380_v55 = vpop.eup %3379 }
 0x4bd   : > { %v1283_v56 = vsel %vm1102_vm9, %v3380_v55, 0.0 }
 0x4be   : > { %1284 = vadd.xlane.f32.xlu1 %v1283_v56 }
 0x4c2   : > { %1289 = vrot.lane.b32.xlu0 %v4250_v40, %s3840_s15 }
 0x4d7   : > { %1342 = vrot.lane.b32.xlu1 %v4220_v1, %s3841_s30 }
 0x521   : > { %v1169_v57 = vpop.xlane.xlu0 %1168 }
 0x522   : > { %3381 = vrcp.f32 %v1169_v57 }
 0x528   : > { %v3382_v58 = vpop.eup %3381 }
 0x529   : > { %v1171_v59 = vmul.f32 %v3382_v58, %v3378_v50 }
 0x52b   : > { %v1172_v60 = vpack.c.bf16 %v1171_v59, %v1171_v59 }
 0x52d   : > { %2819 = vmatmul.msk.bf16.vlgmr.msrb.gmra.mxu0 %vm1102_vm9, %v1172_v60 }
 0x531   : > { %v1285_v61 = vpop.xlane.xlu1 %1284 }
 0x532   : > { %3383 = vrcp.f32 %v1285_v61 }
 0x534   : > { %v1290_v62 = vpop.permute.xlu0 %1289 }
 0x535   : > { %v1295_v0 = vsel %vm1118_vm8, %v1290_v62, 0 }
 0x536   : > { %1304 = vmatpush.bf16.msra.mxu0 %v1295_v0  ;;  %v4304_v0 = vld [vmem:[%s4106_s1 + $0x38] sm:$0xff] }
 0x538   : > { %v3384_v17 = vpop.eup %3383 }
 0x539   : > { %v1287_v1 = vmul.f32 %v3384_v17, %v3380_v55 }
 0x53a   : > { %1418 = vmatpush.bf16.msrb.mxu0 %v4304_v0 }
 0x53b   : > { %v1288_v5 = vpack.c.bf16 %v1287_v1, %v1287_v1 }
 0x53d   : > { %2839 = vmatmul.msk.bf16.vlgmr.msra.gmra.mxu0 %vm1102_vm9, %v1288_v5 }
 0x549   : > { %v1343_v7 = vpop.permute.xlu1 %1342 }
 0x54a   : > { %v1348_v8 = vsel %vm1082_vm7, %v1343_v7, 0  ;;  %v4311_v7 = vld [vmem:[%s4106_s1 + $0x30] sm:$0xff] }
 0x54b   : > { %1357 = vmatpush.bf16.xpose.msra.mxu2 %v1348_v8  ;;  %1419 = vmatpush.bf16.msrb.mxu0 %v4311_v7 }
 0x552   : > { %2849 = vmatmul.msk.bf16.vlgmr.msra.gmra.mxu2 %vm1082_vm7, %v1341_v11 }
 0x553   : > { %1473 = vmatpush.bf16.msrb.mxu2 %v1464_v9 }
 0x557   : > { %1567 = vmatpush.bf16.msra.mxu2 %v4238_v27 }
 0x55b   : > { %1568 = vmatpush.bf16.msra.mxu2 %v4244_v30  ;;  %v1480_v30 = vunpack.c.l.b16 %v1061_v16 }
 0x55d   : > { %v1481_v31 = vpack.c.b16 %v1480_v30, %v1480_v30 }
 0x5aa   : > { %v1193_v20 = vpop.f32.mrf.mxu0 }
 0x5ab   : > { %v1197_v21 = vpack.c.bf16 %v1193_v20, %v1193_v20 }
 0x5ad   : > { %2828 = vmatmul.msk.bf16.vlgmr.msrb.gmra.mxu1 %vm1082_vm7, %v1197_v21 }
 0x5ae   : > { %1442 = vmatpush.bf16.xpose.msrb.mxu1 %v1433_v22 }
 0x5b2   : > { %v1195_v23 = vpop.f32.mrf.mxu0 }
 0x5ba   : > { %v1306_v24 = vpop.f32.mrf.mxu0 }
 0x5bb   : > { %v1310_v25 = vpack.c.bf16 %v1306_v24, %v1306_v24 }
 0x5bd   : > { %2848 = vmatmul.msk.bf16.vlgmr.msra.gmra.mxu1 %vm1082_vm7, %v1310_v25 }
 0x5be   : > { %1551 = vmatpush.bf16.msra.mxu1 %v3162_v13 }
 0x5c2   : > { %v1308_v26 = vpop.f32.mrf.mxu0  ;;  %1552 = vmatpush.bf16.msra.mxu1 %v3161_v63 }
 0x5cd   : > { %2860 = vmatmul.msk.bf16.vlgmr.msrb.gmra.mxu1 %vm1082_vm7, %v1061_v16 }
 0x5ce   : > { %1640 = vmatpush.bf16.msrb.mxu1 %v3164_v4 }
 0x5d2   : > { %1641 = vmatpush.bf16.msrb.mxu1 %v3163_v12 }
 0x5d5   : > { %v1359_v27 = vpop.f32.mrf.mxu2 }
 0x5d6   : > { %v1363_v28 = vsel %vm1102_vm9, %v1359_v27, -inf }
 0x5d7   : > { %1364 = vmax.xlane.f32.xlu1 %v1363_v28 }
 0x5dd   : > { %v1361_v29 = vpop.f32.mrf.mxu2 }
 0x5f0   : > { %1482 = vrot.lane.b32.xlu1 %v1481_v31, %s3839_s24 }
 0x5f8   : > { %1648 = vrot.lane.b32.xlu1 %v1481_v31, %s3841_s30 }
 0x62a   : > { %v1222_v32 = vpop.f32.mrf.mxu1 }
 0x62b   : > { %v1251_v34 = vadd.f32 %v4255_v45, %v1222_v32 }
 0x632   : > { %v1224_v33 = vpop.f32.mrf.mxu1 }
 0x63a   : > { %v1335_v35 = vpop.f32.mrf.mxu1 }
 0x63b   : > { %v4287_v36 = vadd.f32 %v1335_v35, %v1251_v34 }
 0x642   : > { %v1337_v37 = vpop.f32.mrf.mxu1 }
 0x64a   : > { %v1365_v38 = vpop.xlane.xlu1 %1364  ;;  %v1444_v39 = vpop.f32.mrf.mxu1 }
 0x64b   : > { %v1366_v41 = vsub.f32 %v1359_v27, %v1365_v38  ;;  %v1448_v42 = vsel %vm1102_vm9, %v1444_v39, -inf }
 0x64c   : > { %1449 = vmax.xlane.f32.xlu0 %v1448_v42 }
 0x64d   : > { %v1367_v43 = vmul.f32 1.442695, %v1366_v41 }
 0x64f   : > { %3385 = vpow2.f32 %v1367_v43  ;;  %v1518_v43 = vunpack.c.l.b16 %v4270_v6 }
 0x652   : > { %v1446_v44 = vpop.f32.mrf.mxu1 }
 0x653   : > { %v1519_v44 = vpack.c.b16 %v1518_v43, %v1518_v43 }
 0x655   : > { %v3386_v46 = vpop.eup %3385 }
 0x656   : > { %v1369_v47 = vsel %vm1102_vm9, %v3386_v46, 0.0 }
 0x657   : > { %1370 = vadd.xlane.f32.xlu0 %v1369_v47  ;;  %v4331_v47 = vld [vmem:[%s660_s9] ss:$0 sm:$0xff]  ;;  %s3842_s9 = smov [#allocation19]  }
 0x662   : > { %v1483_v1 = vpop.permute.xlu1 %1482 }
 0x66a   : > { %v1649_v18 = vpop.permute.xlu1 %1648 }
 0x66b   : > { %1484 = vrot.lane.b32.xlu0 %v1428_v19, %s3839_s24 }
 0x673   : > { %1650 = vrot.lane.b32.xlu0 %v1428_v19, %s3841_s30 }
 0x67b   : > { %1574 = vrot.lane.b32.xlu0 %v1481_v31, %s3840_s15 }
 0x6bf   : > { %v1450_v45 = vpop.xlane.xlu0 %1449 }
 0x6c0   : > { %v1451_v48 = vsub.f32 %v1444_v39, %v1450_v45 }
 0x6c2   : > { %v1452_v49 = vmul.f32 1.442695, %v1451_v48 }
 0x6c4   : > { %3387 = vpow2.f32 %v1452_v49 }
 0x6ca   : > { %v3388_v50 = vpop.eup %3387  ;;  %v1371_v52 = vpop.xlane.xlu0 %1370 }
 0x6cb   : > { %v1454_v51 = vsel %vm1102_vm9, %v3388_v50, 0.0  ;;  %3389 = vrcp.f32 %v1371_v52 }
 0x6cc   : > { %1455 = vadd.xlane.f32.xlu2 %v1454_v51 }
 0x6d1   : > { %v3390_v55 = vpop.eup %3389 }
 0x6d2   : > { %v1373_v57 = vmul.f32 %v3390_v55, %v3386_v46 }
 0x6dd   : > { %v1485_v53 = vpop.permute.xlu0 %1484 }
 0x6de   : > { %v1490_v13 = vsel %vm1082_vm7, %v1485_v53, 0 }
 0x6e4   : > { %1375 = vrot.lane.b32.xlu2 %v4250_v40, %s3841_s30  ;;  %v1374_v40 = vpack.c.bf16 %v1373_v57, %v1373_v57 }
 0x6e5   : > { %v1651_v60 = vpop.permute.xlu0 %1650 }
 0x6e6   : > { %v1656_v63 = vsel %vm1082_vm7, %v1651_v60, 0 }
 0x6ec   : > { %1576 = vrot.lane.b32.xlu2 %v1428_v19, %s3840_s15 }
 0x6ed   : > { %v1575_v5 = vpop.permute.xlu0 %1574 }
 0x73f   : > { %v1456_v54 = vpop.xlane.xlu2 %1455 }
 0x740   : > { %3391 = vrcp.f32 %v1456_v54 }
 0x746   : > { %v3392_v56 = vpop.eup %3391 }
 0x747   : > { %v1458_v58 = vmul.f32 %v3392_v56, %v3388_v50  ;;  %v1376_v59 = vpop.permute.xlu2 %1375 }
 0x748   : > { %v1381_v61 = vsel %vm1118_vm8, %v1376_v59, 0 }
 0x749   : > { %v1459_v62 = vpack.c.bf16 %v1458_v58, %v1458_v58  ;;  %1390 = vmatpush.bf16.msra.mxu3 %v1381_v61 }
 0x74b   : > { %2861 = vmatmul.msk.bf16.vlgmr.msrb.gmra.mxu2 %vm1102_vm9, %v1459_v62 }
 0x74c   : > { %1665 = vmatpush.bf16.xpose.msrb.mxu2 %v1656_v63  ;;  %2850 = vmatmul.msk.bf16.vlgmr.msra.gmra.mxu3 %vm1102_vm9, %v1374_v40 }
 0x74d   : > { %1499 = vmatpush.bf16.xpose.msrb.mxu3 %v1490_v13 }
 0x74f   : > { %v1577_v4 = vpop.permute.xlu2 %1576 }
 0x750   : > { %v1582_v17 = vsel %vm1082_vm7, %v1577_v4, 0 }
 0x755   : > { %1591 = vmatpush.bf16.xpose.msra.mxu3 %v1582_v17 }
 0x75c   : > { %2862 = vmatmul.msk.bf16.vlgmr.msrb.gmra.mxu3 %vm1082_vm7, %v1483_v1 }
 0x76c   : > { %2866 = vmatmul.msk.bf16.vlgmr.msra.gmra.mxu3 %vm1082_vm7, %v1575_v5 }
 0x7ce   : > { %v1475_v8 = vpop.f32.mrf.mxu2 }
 0x7cf   : > { %v1479_v9 = vpack.c.bf16 %v1475_v8, %v1475_v8  ;;  %v1392_v11 = vpop.f32.mrf.mxu3 }
 0x7d0   : > { %v1396_v12 = vpack.c.bf16 %v1392_v11, %v1392_v11 }
 0x7d1   : > { %2865 = vmatmul.msk.bf16.vlgmr.msra.gmra.mxu2 %vm1082_vm7, %v1479_v9 }
 0x7d2   : > { %2859 = vmatmul.msk.bf16.vlgmr.msrb.gmra.mxu0 %vm1082_vm7, %v1396_v12 }
 0x7d6   : > { %v1477_v14 = vpop.f32.mrf.mxu2 }
 0x7d7   : > { %v1394_v15 = vpop.f32.mrf.mxu3 }
 0x7df   : > { %v1501_v16 = vpop.f32.mrf.mxu3 }
 0x7e0   : > { %v1505_v19 = vsel %vm1102_vm9, %v1501_v16, -inf }
 0x7e1   : > { %1506 = vmax.xlane.f32.xlu2 %v1505_v19  ;;  %2869 = vmatmul.msk.bf16.vlgmr.msrb.gmra.mxu2 %vm1082_vm7, %v1649_v18 }
 0x7e7   : > { %v1503_v20 = vpop.f32.mrf.mxu3 }
 0x7ef   : > { %v1593_v21 = vpop.f32.mrf.mxu3 }
 0x7f0   : > { %v1597_v22 = vsel %vm1102_vm9, %v1593_v21, -inf }
 0x7f1   : > { %1598 = vmax.xlane.f32.xlu0 %v1597_v22 }
 0x7f7   : > { %v1595_v23 = vpop.f32.mrf.mxu3 }
 0x84f   : > { %v1421_v24 = vpop.f32.mrf.mxu0 }
 0x850   : > { %v1425_v25 = vadd.f32 %v1421_v24, %v4287_v36 }
 0x852   : > { %v1722_v46 = vadd.f32 %v1425_v25, %v4144_v2 }
 0x854   : > { %v4320_v26 = vpop.f32.mrf.mxu2  ;;  %v1507_v27 = vpop.xlane.xlu2 %1506  ;;  %v4334_v45 = vadd.f32 %v4331_v47, %v1722_v46 }
 0x855   : > { %v1508_v28 = vsub.f32 %v1501_v16, %v1507_v27 }
 0x857   : > { %v1509_v29 = vmul.f32 1.442695, %v1508_v28  ;;  %v1423_v30 = vpop.f32.mrf.mxu0 }
 0x859   : > { %3393 = vpow2.f32 %v1509_v29 }
 0x85c   : > { %v1572_v31 = vpop.f32.mrf.mxu2 }
 0x85f   : > { %v3394_v32 = vpop.eup %3393 }
 0x860   : > { %v1511_v33 = vsel %vm1102_vm9, %v3394_v32, 0.0 }
 0x861   : > { %1512 = vadd.xlane.f32.xlu2 %v1511_v33  ;;  %v2986_v33 = vld [vmem:[%s4120_s4 + $0xe0] sm:$0xf] }
 0x864   : > { %v1667_v34 = vpop.f32.mrf.mxu2  ;;  %v1599_v35 = vpop.xlane.xlu0 %1598 }
 0x865   : > { %v1600_v37 = vsub.f32 %v1593_v21, %v1599_v35  ;;  %v1671_v38 = vsel %vm1102_vm9, %v1667_v34, -inf  ;;  %v3195_v35 = vld [vmem:[%s4120_s4 + $0xe4] sm:$0xf] }
 0x866   : > { %1672 = vmax.xlane.f32.xlu1 %v1671_v38  ;;  %v2994_v38 = vld [vmem:[%s4120_s4 + $0xe8] sm:$0xf] }
 0x867   : > { %v1601_v36 = vmul.f32 1.442695, %v1600_v37  ;;  %v2988_v37 = vld [vmem:[%s4120_s4 + $0xf0] sm:$0xf0] }
 0x869   : > { %3395 = vpow2.f32 %v1601_v36  ;;  %v3198_v36 = vld [vmem:[%s4120_s4 + $0xf4] sm:$0xf0] }
 0x86c   : > { %v1669_v39 = vpop.f32.mrf.mxu2 }
 0x86d   : > { %v2991_v39 = vor.u32 %v3195_v35, %v2988_v37  ;;  %v3180_v37 = vld [vmem:[%s4120_s4 + $0x6c] sm:$0xf] }
 0x86f   : > { %v3396_v41 = vpop.eup %3395  ;;  %1999 = vmatpush.bf16.msra.mxu2 %v2991_v39  ;;  %v2906_v39 = vld [vmem:[%s4120_s4 + $0x40] sm:$0xf] }
 0x870   : > { %v1603_v42 = vsel %vm1102_vm9, %v3396_v41, 0.0 }
 0x871   : > { %1604 = vadd.xlane.f32.xlu2 %v1603_v42  ;;  %v3196_v42 = vld [vmem:[%s4120_s4 + $0xec] sm:$0xf] }
 0x87f   : > { %1520 = vrot.lane.b32.xlu1 %v1519_v44, %s3839_s24 }
 0x889   : > { %1609 = vrot.lane.b32.xlu2 %v1519_v44, %s3840_s15 }
 0x8a9   : > { %1732 = vadd.xlane.f32.xlu1 %v4334_v45 }
 0x8d4   : > { %v1513_v51 = vpop.xlane.xlu2 %1512 }
 0x8d9   : > { %v1673_v48 = vpop.xlane.xlu1 %1672 }
 0x8da   : > { %v1674_v49 = vsub.f32 %v1667_v34, %v1673_v48  ;;  %v3197_v34 = vld [vmem:[%s4120_s4 + $0xec] sm:$0xf0] }
 0x8dc   : > { %v1675_v50 = vmul.f32 1.442695, %v1674_v49  ;;  %v2970_v49 = vld [vmem:[%s4120_s4 + $0xc0] sm:$0xf] }
 0x8de   : > { %3397 = vpow2.f32 %v1675_v50  ;;  %v3193_v50 = vld [vmem:[%s4120_s4 + $0xcc] sm:$0xf0] }
 0x8df   : > { %3399 = vrcp.f32 %v1513_v51  ;;  %v3191_v51 = vld [vmem:[%s4120_s4 + $0xc4] sm:$0xf] }
 0x8e4   : > { %v3398_v6 = vpop.eup %3397  ;;  %v1605_v53 = vpop.xlane.xlu2 %1604 }
 0x8e5   : > { %v1677_v52 = vsel %vm1102_vm9, %v3398_v6, 0.0  ;;  %v3400_v2 = vpop.eup %3399  ;;  %3401 = vrcp.f32 %v1605_v53  ;;  %v2978_v53 = vld [vmem:[%s4120_s4 + $0xc8] sm:$0xf] }
 0x8e6   : > { %1678 = vadd.xlane.f32.xlu0 %v1677_v52  ;;  %v1515_v54 = vmul.f32 %v3400_v2, %v3394_v32  ;;  %v2972_v52 = vld [vmem:[%s4120_s4 + $0xd0] sm:$0xf0]  ;;  %v3194_v2 = vld [vmem:[%s4120_s4 + $0xd4] sm:$0xf0] }
 0x8e8   : > { %v1516_v59 = vpack.c.bf16 %v1515_v54, %v1515_v54  ;;  %v2975_v54 = vor.u32 %v3191_v51, %v2972_v52  ;;  %v2916_v51 = vld [vmem:[%s4120_s4 + $0x58] sm:$0xf0]  ;;  %v2890_v52 = vld [vmem:[%s4120_s4 + $0x20] sm:$0xf] }
 0x8ea   : > { %2000 = vmatpush.bf16.msra.mxu2 %v2975_v54 }
 0x8eb   : > { %v3402_v60 = vpop.eup %3401 }
 0x8ec   : > { %v1610_v55 = vpop.permute.xlu2 %1609  ;;  %v1607_v61 = vmul.f32 %v3402_v60, %v3396_v41  ;;  %v2995_v41 = vor.u32 %v3198_v36, %v2994_v38  ;;  %v2954_v60 = vld [vmem:[%s4120_s4 + $0xa0] sm:$0xf]  ;;  %v2932_v38 = vld [vmem:[%s4120_s4 + $0x78] sm:$0xf0] }
 0x8ed   : > { %v1615_v58 = vsel %vm1118_vm8, %v1610_v55, 0  ;;  %v2979_v55 = vor.u32 %v3194_v2, %v2978_v53  ;;  %v2935_v36 = vor.u32 %v3180_v37, %v2932_v38  ;;  %v3173_v53 = vld [vmem:[%s4120_s4 + $0x2c] sm:$0xf0]  ;;  %v3171_v2 = vld [vmem:[%s4120_s4 + $0x24] sm:$0xf] }
 0x8ee   : > { %v1608_v13 = vpack.c.bf16 %v1607_v61, %v1607_v61  ;;  %v3189_v61 = vld [vmem:[%s4120_s4 + $0xac] sm:$0xf0]  ;;  %v2891_v54 = vor.u32 %v3173_v53, %v2890_v52  ;;  %v3365_v37 = vld [vmem:[%s4588_s17] ss:$0 sm:$0xff]  ;;  %v3212_v52 = vld [vmem:[%s4123_s2 + $0x68] sm:$0xff] }
 0x8ef   : > { %v3220_v53 = vld [vmem:[%s4123_s2 + $0xa8] sm:$0xff] }
 0x8f1   : > { %v1521_v56 = vpop.permute.xlu1 %1520 }
 0x8f2   : > { %v1526_v57 = vsel %vm1118_vm8, %v1521_v56, 0  ;;  %v3192_v56 = vld [vmem:[%s4120_s4 + $0xcc] sm:$0xf] }
 0x8f3   : > { %1535 = vmatpush.bf16.msra.mxu0 %v1526_v57  ;;  %v2980_v57 = vld [vmem:[%s4120_s4 + $0xd8] sm:$0xf0] }
 0x8f6   : > { %2863 = vmatmul.msk.bf16.vlgmr.msra.gmra.mxu0 %vm1102_vm9, %v1516_v59 }
 0x8f7   : > { %1624 = vmatpush.bf16.msrb.mxu0 %v1615_v58  ;;  %v2983_v58 = vor.u32 %v3192_v56, %v2980_v57  ;;  %v2898_v56 = vld [vmem:[%s4120_s4 + $0x28] sm:$0xf]  ;;  %v3174_v57 = vld [vmem:[%s4120_s4 + $0x34] sm:$0xf0] }
 0x8fa   : > { %1683 = vrot.lane.b32.xlu0 %v1519_v44, %s3841_s30 }
 0x8fb   : > { %1714 = vmatpush.bf16.msra.mxu0 %v4304_v0 }
 0x8ff   : > { %1715 = vmatpush.bf16.msra.mxu0 %v4311_v7 }
 0x906   : > { %2867 = vmatmul.msk.bf16.vlgmr.msrb.gmra.mxu0 %vm1102_vm9, %v1608_v13  ;;  %v3187_v13 = vld [vmem:[%s4120_s4 + $0xa4] sm:$0xf] }
 0x91c   : > { %v1733_v62 = vpop.xlane.xlu1 %1732 }
 0x91d   : > { %v1736_v40 = vmul.f32 %v1733_v62, %v4150_v10  ;;  %v2955_v62 = vor.u32 %v3189_v61, %v2954_v60  ;;  %v3172_v60 = vld [vmem:[%s4120_s4 + $0x2c] sm:$0xf]  ;;  %v2900_v61 = vld [vmem:[%s4120_s4 + $0x38] sm:$0xf0] }
 0x91f   : > { %v4347_v63 = vsub.f32 %v4334_v45, %v1736_v40  ;;  %v2956_v40 = vld [vmem:[%s4120_s4 + $0xb0] sm:$0xf0] }
 0x921   : > { %v1740_v4 = vmul.f32 %v4347_v63, %v4347_v63 }
 0x923   : > { %1742 = vadd.xlane.f32.xlu2 %v1740_v4  ;;  %v2962_v4 = vld [vmem:[%s4120_s4 + $0xa8] sm:$0xf] }
 0x959   : > { %v1679_v0 = vpop.xlane.xlu0 %1678 }
 0x95a   : > { %3403 = vrcp.f32 %v1679_v0  ;;  %v3190_v0 = vld [vmem:[%s4120_s4 + $0xb4] sm:$0xf0] }
 0x960   : > { %v3404_v17 = vpop.eup %3403 }
 0x961   : > { %v1681_v1 = vmul.f32 %v3404_v17, %v3398_v6  ;;  %v2971_v6 = vor.u32 %v3193_v50, %v2970_v49  ;;  %v2959_v17 = vor.u32 %v3187_v13, %v2956_v40  ;;  %v3176_v50 = vld [vmem:[%s4120_s4 + $0x4c] sm:$0xf]  ;;  %v2874_v13 = vld [vmem:[%s4120_s4] sm:$0xf]  ;;  %v2903_v40 = vor.u32 %v3172_v60, %v2900_v61  ;;  %v3218_v60 = vld [vmem:[%s4123_s2 + $0x98] sm:$0xff] }
 0x962   : > { %v4468_v61 = vld [vmem:[%s4141_s16] sm:$0xf] }
 0x963   : > { %v1682_v8 = vpack.c.bf16 %v1681_v1, %v1681_v1  ;;  %v2963_v1 = vor.u32 %v3190_v0, %v2962_v4  ;;  %2001 = vmatpush.bf16.msra.mxu2 %v2959_v17  ;;  %v3169_v4 = vld [vmem:[%s4120_s4 + $0xc] sm:$0xf0]  ;;  %v3167_v0 = vld [vmem:[%s4120_s4 + $0x4] sm:$0xf]  ;;  %v2876_v17 = vld [vmem:[%s4120_s4 + $0x10] sm:$0xf0] }
 0x96c   : > { %v1684_v5 = vpop.permute.xlu0 %1683 }
 0x96d   : > { %v1689_v7 = vsel %vm1118_vm8, %v1684_v5, 0  ;;  %v3188_v5 = vld [vmem:[%s4120_s4 + $0xac] sm:$0xf] }
 0x96e   : > { %1698 = vmatpush.bf16.msrb.mxu3 %v1689_v7  ;;  %v2964_v7 = vld [vmem:[%s4120_s4 + $0xb8] sm:$0xf0] }
 0x971   : > { %2870 = vmatmul.msk.bf16.vlgmr.msrb.gmra.mxu3 %vm1102_vm9, %v1682_v8 }
 0x972   : > { %2013 = vmatpush.bf16.msra.mxu3 %v2995_v41  ;;  %v3177_v41 = vld [vmem:[%s4120_s4 + $0x4c] sm:$0xf0] }
 0x973   : > { %v1537_v9 = vpop.f32.mrf.mxu0 }
 0x974   : > { %v1541_v11 = vpack.c.bf16 %v1537_v9, %v1537_v9  ;;  %v2967_v9 = vor.u32 %v3188_v5, %v2964_v7  ;;  %v2879_v5 = vor.u32 %v3167_v0, %v2876_v17  ;;  %v2882_v7 = vld [vmem:[%s4120_s4 + $0x8] sm:$0xf]  ;;  %v3199_v0 = vld [vmem:[%s4123_s2] sm:$0xff] }
 0x975   : > { %v3223_v17 = vld [vmem:[%s4123_s2 + $0xc0] sm:$0xff] }
 0x976   : > { %2864 = vmatmul.msk.bf16.vlgmr.msra.gmra.mxu1 %vm1082_vm7, %v1541_v11  ;;  %2014 = vmatpush.bf16.msra.mxu3 %v2979_v55  ;;  %v2938_v11 = vld [vmem:[%s4120_s4 + $0x80] sm:$0xf]  ;;  %v2892_v55 = vld [vmem:[%s4120_s4 + $0x30] sm:$0xf0] }
 0x97a   : > { %2015 = vmatpush.bf16.msra.mxu3 %v2963_v1  ;;  %v2875_v1 = vor.u32 %v3169_v4, %v2874_v13  ;;  %v3200_v13 = vld [vmem:[%s4123_s2 + $0x8] sm:$0xff]  ;;  %v3217_v4 = vld [vmem:[%s4123_s2 + $0x90] sm:$0xff] }
 0x97b   : > { %v1539_v12 = vpop.f32.mrf.mxu0 }
 0x97c   : > { %v3185_v12 = vld [vmem:[%s4120_s4 + $0x8c] sm:$0xf0] }
 0x983   : > { %v1626_v14 = vpop.f32.mrf.mxu0 }
 0x984   : > { %v1630_v15 = vpack.c.bf16 %v1626_v14, %v1626_v14  ;;  %v3183_v14 = vld [vmem:[%s4120_s4 + $0x84] sm:$0xf] }
 0x986   : > { %2868 = vmatmul.msk.bf16.vlgmr.msrb.gmra.mxu1 %vm1082_vm7, %v1630_v15  ;;  %v2939_v15 = vor.u32 %v3185_v12, %v2938_v11  ;;  %v2884_v12 = vld [vmem:[%s4120_s4 + $0x18] sm:$0xf0] }
 0x98b   : > { %v1628_v16 = vpop.f32.mrf.mxu0 }
 0x98c   : > { %v2940_v16 = vld [vmem:[%s4120_s4 + $0x90] sm:$0xf0] }
 0x996   : > { %v1743_v59 = vpop.xlane.xlu2 %1742 }
 0x997   : > { %v1746_v8 = vmul.f32 %v1743_v59, %v4150_v10  ;;  %v2899_v59 = vor.u32 %v3174_v57, %v2898_v56  ;;  %v3219_v56 = vld [vmem:[%s4123_s2 + $0xa0] sm:$0xff]  ;;  %v3201_v57 = vld [vmem:[%s4123_s2 + $0x10] sm:$0xff] }
 0x9f3   : > { %v1554_v18 = vpop.f32.mrf.mxu1 }
 0x9f4   : > { %v1700_v19 = vpop.f32.mrf.mxu3  ;;  %v1571_v23 = vadd.f32 %v4320_v26, %v1554_v18  ;;  %v2987_v26 = vor.u32 %v3197_v34, %v2986_v33  ;;  %v2946_v18 = vld [vmem:[%s4120_s4 + $0x88] sm:$0xf]  ;;  %v3182_v34 = vld [vmem:[%s4120_s4 + $0x74] sm:$0xf0] }
 0x9f5   : > { %v1704_v20 = vpack.c.bf16 %v1700_v19, %v1700_v19  ;;  %v3186_v19 = vld [vmem:[%s4120_s4 + $0x94] sm:$0xf0]  ;;  %v2930_v33 = vld [vmem:[%s4120_s4 + $0x68] sm:$0xf] }
 0x9f6   : > { %1985 = vmatpush.bf16.msra.mxu1 %v2987_v26  ;;  %v2931_v26 = vor.u32 %v3182_v34, %v2930_v33  ;;  %v3364_v33 = vld [vmem:[%s669_s23] ss:$0 sm:$0xff]  ;;  %s2445_s23 = sshll.u32 %s3842_s9, 4  ;;  %s2446_s23 = int_to_ptr.vmem [resolvable:$true] %s2445_s23 }
 0x9f7   : > { %2871 = vmatmul.msk.bf16.vlgmr.msra.gmra.mxu0 %vm1082_vm7, %v1704_v20  ;;  %v2943_v20 = vor.u32 %v3183_v14, %v2940_v16 }
 0x9f9   : > { %2002 = vmatpush.bf16.msra.mxu2 %v2943_v20 }
 0x9fa   : > { %1986 = vmatpush.bf16.msra.mxu1 %v2971_v6  ;;  %v2919_v6 = vor.u32 %v3176_v50, %v2916_v51  ;;  %v3221_v50 = vld [vmem:[%s4123_s2 + $0xb0] sm:$0xff]  ;;  %v3203_v51 = vld [vmem:[%s4123_s2 + $0x20] sm:$0xff] }
 0x9fb   : > { %v1556_v21 = vpop.f32.mrf.mxu1 }
 0x9fc   : > { %v1702_v22 = vpop.f32.mrf.mxu3  ;;  %v2947_v21 = vor.u32 %v3186_v19, %v2946_v18 }
 0x9fd   : > { %v3184_v22 = vld [vmem:[%s4120_s4 + $0x8c] sm:$0xf] }
 0x9fe   : > { %1987 = vmatpush.bf16.msra.mxu1 %v2955_v62  ;;  %2016 = vmatpush.bf16.msra.mxu3 %v2947_v21 }
 0xa02   : > { %1988 = vmatpush.bf16.msra.mxu1 %v2939_v15  ;;  %2017 = vmatpush.bf16.msra.mxu3 %v2931_v26 }
 0xa03   : > { %v1643_v24 = vpop.f32.mrf.mxu1 }
 0xa04   : > { %v1647_v25 = vadd.f32 %v1643_v24, %v1571_v23  ;;  %v2948_v23 = vld [vmem:[%s4120_s4 + $0x98] sm:$0xf0]  ;;  %v4401_v24 = vadd.f32 1e-05, %v1746_v8  ;;  %v3170_v8 = vld [vmem:[%s4120_s4 + $0x14] sm:$0xf0] }
 0xa05   : > { %v2883_v11 = vor.u32 %v3170_v8, %v2882_v7  ;;  %v3208_v7 = vld [vmem:[%s4123_s2 + $0x48] sm:$0xff] }
 0xa06   : > { %3405 = vrsqrt.f32 %v4401_v24  ;;  %vm1756_vm11 = vweird.f32 %v4401_v24  ;;  %v3216_v8 = vld [vmem:[%s4123_s2 + $0x88] sm:$0xff] }
 0xa0b   : > { %v1645_v27 = vpop.f32.mrf.mxu1 }
 0xa0c   : > { %v2922_v27 = vld [vmem:[%s4120_s4 + $0x60] sm:$0xf]  ;;  %v3406_v62 = vpop.eup %3405 }
 0xa0d   : > { %v1751_v14 = vmul.f32 %v3406_v62, %v4401_v24  ;;  %vm1757_vm10 = vweird.f32 %v3406_v62 }
 0xa0e   : > { %vm1758_vm12 = vmor %vm1756_vm11, %vm1757_vm10 }
 0xa0f   : > { %v1752_v16 = vmul.f32 %v3406_v62, %v1751_v14 }
 0xa11   : > { %v1753_v21 = vmul.f32 0.5, %v1752_v16  ;;  %v1818_v16 = vperm.slane %v4468_v61, 1 }
 0xa74   : > { %v1717_v28 = vpop.f32.mrf.mxu0 }
 0xa75   : > { %v1721_v29 = vadd.f32 %v1717_v28, %v1647_v25  ;;  %v2951_v25 = vor.u32 %v3184_v22, %v2948_v23  ;;  %v3181_v28 = vld [vmem:[%s4120_s4 + $0x6c] sm:$0xf0]  ;;  %v1754_v22 = vsub.f32 1.5, %v1753_v21  ;;  %v1819_v21 = vperm.slane %v4468_v61, 2 }
 0xa77   : > { %v1723_v30 = vadd.f32 %v1721_v29, %v4147_v3  ;;  %v2996_v3 = vld [vmem:[%s4120_s4 + $0xf8] sm:$0xf0]  ;;  %v3179_v29 = vld [vmem:[%s4120_s4 + $0x64] sm:$0xf] }
 0xa78   : > { %v2999_v43 = vor.u32 %v3196_v42, %v2996_v3  ;;  %v3175_v42 = vld [vmem:[%s4120_s4 + $0x44] sm:$0xf]  ;;  %v2907_v3 = vor.u32 %v3177_v41, %v2906_v39  ;;  %v3206_v41 = vld [vmem:[%s4123_s2 + $0x38] sm:$0xff] }
 0xa79   : > { %v4359_v31 = vadd.f32 %v4331_v47, %v1723_v30  ;;  %v2923_v30 = vor.u32 %v3181_v28, %v2922_v27 }
 0xa7a   : > { %2027 = vmatpush.bf16.msrb.mxu0 %v2999_v43  ;;  %v2908_v43 = vld [vmem:[%s4120_s4 + $0x50] sm:$0xf0] }
 0xa7b   : > { %1734 = vadd.xlane.f32.xlu0 %v4359_v31  ;;  %1989 = vmatpush.bf16.msra.mxu1 %v2923_v30 }
 0xa7c   : > { %v1719_v32 = vpop.f32.mrf.mxu0 }
 0xa7d   : > { %v2924_v32 = vld [vmem:[%s4120_s4 + $0x70] sm:$0xf0] }
 0xa7e   : > { %2028 = vmatpush.bf16.msrb.mxu0 %v2983_v58  ;;  %v2927_v35 = vor.u32 %v3179_v29, %v2924_v32  ;;  %v2895_v58 = vor.u32 %v3171_v2, %v2892_v55  ;;  %v3202_v2 = vld [vmem:[%s4123_s2 + $0x18] sm:$0xff]  ;;  %v3211_v55 = vld [vmem:[%s4123_s2 + $0x60] sm:$0xff] }
 0xa7f   : > { %1990 = vmatpush.bf16.msra.mxu1 %v2907_v3  ;;  %v3229_v3 = vld [vmem:[%s4123_s2 + $0xf0] sm:$0xff] }
 0xa80   : > { %2003 = vmatpush.bf16.msra.mxu2 %v2927_v35 }
 0xa82   : > { %2029 = vmatpush.bf16.msrb.mxu0 %v2967_v9  ;;  %v3168_v9 = vld [vmem:[%s4120_s4 + $0xc] sm:$0xf] }
 0xa83   : > { %1991 = vmatpush.bf16.msra.mxu1 %v2891_v54  ;;  %v2887_v15 = vor.u32 %v3168_v9, %v2884_v12  ;;  %v3226_v54 = vld [vmem:[%s4123_s2 + $0xd8] sm:$0xff] }
 0xa86   : > { %2030 = vmatpush.bf16.msrb.mxu0 %v2951_v25  ;;  %v1755_v25 = vmul.f32 %v3406_v62, %v1754_v22 }
 0xa87   : > { %1992 = vmatpush.bf16.msra.mxu1 %v2875_v1  ;;  %v1817_v1 = vperm.slane %v4468_v61, 0 }
 0xa88   : > { %v1759_v29 = vsel %vm1758_vm12, %v3406_v62, %v1755_v25  ;;  %v3224_v62 = vld [vmem:[%s4123_s2 + $0xc8] sm:$0xff] }
 0xa8a   : > { %2031 = vmatpush.bf16.msrb.mxu0 %v2935_v36 }
 0xa8b   : > { %2377 = vmatpush.bf16.msrb.mxu1 %v3206_v41 }
 0xa8e   : > { %2032 = vmatpush.bf16.msrb.mxu0 %v2919_v6  ;;  %v3227_v6 = vld [vmem:[%s4123_s2 + $0xe0] sm:$0xff] }
 0xa92   : > { %2033 = vmatpush.bf16.msrb.mxu0 %v2903_v40  ;;  %v3209_v40 = vld [vmem:[%s4123_s2 + $0x50] sm:$0xff] }
 0xa96   : > { %2034 = vmatpush.bf16.msrb.mxu0 %v2887_v15 }
 0xaee   : > { %v1735_v44 = vpop.xlane.xlu0 %1734 }
 0xaef   : > { %v1737_v46 = vmul.f32 %v1735_v44, %v4150_v10  ;;  %v2914_v44 = vld [vmem:[%s4120_s4 + $0x48] sm:$0xf] }
 0xaf1   : > { %v4372_v47 = vsub.f32 %v4359_v31, %v1737_v46  ;;  %v3178_v46 = vld [vmem:[%s4120_s4 + $0x54] sm:$0xf0] }
 0xaf2   : > { %v2915_v49 = vor.u32 %v3178_v46, %v2914_v44  ;;  %v3222_v44 = vld [vmem:[%s4123_s2 + $0xb8] sm:$0xff]  ;;  %v3204_v46 = vld [vmem:[%s4123_s2 + $0x28] sm:$0xff] }
 0xaf3   : > { %v1741_v48 = vmul.f32 %v4372_v47, %v4372_v47 }
 0xaf4   : > { %2018 = vmatpush.bf16.msra.mxu3 %v2915_v49  ;;  %v3213_v49 = vld [vmem:[%s4123_s2 + $0x70] sm:$0xff] }
 0xaf5   : > { %1744 = vadd.xlane.f32.xlu1 %v1741_v48  ;;  %v2911_v48 = vor.u32 %v3175_v42, %v2908_v43  ;;  %v3230_v42 = vld [vmem:[%s4123_s2 + $0xf8] sm:$0xff] }
 0xaf6   : > { %2419 = vmatpush.bf16.msra.mxu0 %v3230_v42  ;;  %v3214_v43 = vld [vmem:[%s4123_s2 + $0x78] sm:$0xff] }
 0xaf7   : > { %2004 = vmatpush.bf16.msra.mxu2 %v2911_v48  ;;  %v3228_v48 = vld [vmem:[%s4123_s2 + $0xe8] sm:$0xff] }
 0xaf8   : > { %2019 = vmatpush.bf16.msra.mxu3 %v2899_v59  ;;  %v3210_v59 = vld [vmem:[%s4123_s2 + $0x58] sm:$0xff] }
 0xafa   : > { %2420 = vmatpush.bf16.msra.mxu0 %v3229_v3 }
 0xafb   : > { %2005 = vmatpush.bf16.msra.mxu2 %v2895_v58  ;;  %v3225_v58 = vld [vmem:[%s4123_s2 + $0xd0] sm:$0xff] }
 0xafc   : > { %2020 = vmatpush.bf16.msra.mxu3 %v2883_v11 }
 0xafe   : > { %2421 = vmatpush.bf16.msra.mxu0 %v3228_v48 }
 0xaff   : > { %2006 = vmatpush.bf16.msra.mxu2 %v2879_v5  ;;  %v1820_v5 = vperm.slane %v4468_v61, 3 }
 0xb00   : > { %2405 = vmatpush.bf16.msrb.mxu3 %v3222_v44 }
 0xb02   : > { %2422 = vmatpush.bf16.msra.mxu0 %v3227_v6 }
 0xb03   : > { %2391 = vmatpush.bf16.msrb.mxu2 %v3214_v43 }
 0xb04   : > { %2406 = vmatpush.bf16.msrb.mxu3 %v3221_v50 }
 0xb06   : > { %2423 = vmatpush.bf16.msra.mxu0 %v3226_v54 }
 0xb07   : > { %2392 = vmatpush.bf16.msrb.mxu2 %v3213_v49 }
 0xb08   : > { %2407 = vmatpush.bf16.msrb.mxu3 %v3220_v53 }
 0xb0a   : > { %2424 = vmatpush.bf16.msra.mxu0 %v3225_v58 }
 0xb0b   : > { %2393 = vmatpush.bf16.msrb.mxu2 %v3212_v52 }
 0xb0c   : > { %2408 = vmatpush.bf16.msrb.mxu3 %v3219_v56 }
 0xb0e   : > { %2425 = vmatpush.bf16.msra.mxu0 %v3224_v62 }
 0xb0f   : > { %2394 = vmatpush.bf16.msrb.mxu2 %v3211_v55 }
 0xb10   : > { %2409 = vmatpush.bf16.msrb.mxu3 %v3218_v60 }
 0xb12   : > { %2426 = vmatpush.bf16.msra.mxu0 %v3223_v17 }
 0xb13   : > { %2395 = vmatpush.bf16.msrb.mxu2 %v3210_v59 }
 0xb14   : > { %2410 = vmatpush.bf16.msrb.mxu3 %v3217_v4 }
 0xb17   : > { %2396 = vmatpush.bf16.msrb.mxu2 %v3209_v40 }
 0xb18   : > { %2411 = vmatpush.bf16.msrb.mxu3 %v3216_v8 }
 0xb1b   : > { %2397 = vmatpush.bf16.msrb.mxu2 %v3208_v7 }
 0xb68   : > { %v1745_v18 = vpop.xlane.xlu1 %1744 }
 0xb69   : > { %v1747_v19 = vmul.f32 %v1745_v18, %v4150_v10  ;;  %v1770_v10 = vmul.f32 %v1759_v29, %v4347_v63  ;;  %v3207_v18 = vld [vmem:[%s4123_s2 + $0x40] sm:$0xff] }
 0xb6a   : > { %2398 = vmatpush.bf16.msrb.mxu2 %v3207_v18 }
 0xb6b   : > { %v1749_v20 = vadd.f32 1e-05, %v1747_v19  ;;  %v1775_v24 = vmul.f32 %v3364_v33, %v1770_v10  ;;  %v3215_v19 = vld [vmem:[%s4123_s2 + $0x80] sm:$0xff] }
 0xb6c   : > { %2412 = vmatpush.bf16.msrb.mxu3 %v3215_v19 }
 0xb6d   : > { %3407 = vrsqrt.f32 %v1749_v20  ;;  %vm1766_vm14 = vweird.f32 %v1749_v20  ;;  %v1780_v36 = vadd.f32 %v3365_v37, %v1775_v24 }
 0xb73   : > { %v3408_v23 = vpop.eup %3407 }
 0xb74   : > { %v1761_v27 = vmul.f32 %v3408_v23, %v1749_v20  ;;  %vm1767_vm13 = vweird.f32 %v3408_v23 }
 0xb75   : > { %vm1768_vm15 = vmor %vm1766_vm14, %vm1767_vm13 }
 0xb76   : > { %v1762_v28 = vmul.f32 %v3408_v23, %v1761_v27 }
 0xb78   : > { %v1763_v30 = vmul.f32 0.5, %v1762_v28 }
 0xb7a   : > { %v1764_v32 = vsub.f32 1.5, %v1763_v30 }
 0xb7c   : > { %v1765_v34 = vmul.f32 %v3408_v23, %v1764_v32 }
 0xb7e   : > { %v1769_v35 = vsel %vm1768_vm15, %v3408_v23, %v1765_v34 }
 0xb7f   : > { %v1771_v26 = vmul.f32 %v1769_v35, %v4372_v47  ;;  %v3205_v47 = vld [vmem:[%s4123_s2 + $0x30] sm:$0xff]  ;;  %s2447_s2 = sshll.u32 %s4590_s18, 4  ;;  %s2448_s2 = int_to_ptr.hbm [resolvable:$true] %s2447_s2 }
 0xb80   : > { %2378 = vmatpush.bf16.msrb.mxu1 %v3205_v47 }
 0xb81   : > { %v1776_v38 = vmul.f32 %v3364_v33, %v1771_v26 }
 0xb83   : > { %v1781_v63 = vadd.f32 %v3365_v37, %v1776_v38 }
 0xb84   : > { %2379 = vmatpush.bf16.msrb.mxu1 %v3204_v46 }
 0xb85   : > { %v1782_v39 = vpack.c.bf16 %v1781_v63, %v1780_v36 }
 0xb87   : > { %1993 = vmatmul.bf16.vlgmr.msra.gmra.mxu1 %v1782_v39  ;;  %2007 = vmatmul.bf16.vlgmr.msra.gmra.mxu2 %v1782_v39 }
 0xb88   : > { %2021 = vmatmul.bf16.vlgmr.msra.gmra.mxu3 %v1782_v39  ;;  %2035 = vmatmul.bf16.vlgmr.msrb.gmra.mxu0 %v1782_v39 }
 0xb89   : > { %2380 = vmatpush.bf16.msrb.mxu1 %v3203_v51 }
 0xb8d   : > { %2381 = vmatpush.bf16.msrb.mxu1 %v3202_v2 }
 0xb91   : > { %2382 = vmatpush.bf16.msrb.mxu1 %v3201_v57 }
 0xb95   : > { %2383 = vmatpush.bf16.msrb.mxu1 %v3200_v13 }
 0xb99   : > { %2384 = vmatpush.bf16.msrb.mxu1 %v3199_v0 }
 0xc04   : > { %v1994_v9 = vpop.f32.mrf.mxu1 }
 0xc05   : > { %v4480_v11 = vadd.f32 %v1994_v9, %v1817_v1  ;;  %v2036_v12 = vpop.f32.mrf.mxu0 }
 0xc06   : > { %v4482_v14 = vadd.f32 %v2036_v12, %v1820_v5 }
 0xc07   : > { %v2049_v15 = vmul.f32 0.044715, %v4480_v11  ;;  %v2041_v18 = vmul.f32 0.5, %v4480_v11 }
 0xc08   : > { %v2052_v20 = vmul.f32 0.044715, %v4482_v14 }
 0xc09   : > { %v2057_v22 = vmul.f32 %v2049_v15, %v4480_v11 }
 0xc0a   : > { %v2060_v23 = vmul.f32 %v2052_v20, %v4482_v14  ;;  %v2008_v25 = vpop.f32.mrf.mxu2 }
 0xc0b   : > { %v2065_v27 = vmul.f32 %v2057_v22, %v4480_v11  ;;  %v4493_v28 = vadd.f32 %v2008_v25, %v1818_v16  ;;  %v2022_v29 = vpop.f32.mrf.mxu3  ;;  %v2044_v22 = vmul.f32 0.5, %v4482_v14 }
 0xc0c   : > { %v2068_v30 = vmul.f32 %v2060_v23, %v4482_v14  ;;  %v4496_v32 = vadd.f32 %v2022_v29, %v1819_v21  ;;  %v1996_v10 = vpop.f32.mrf.mxu1 }
 0xc0d   : > { %v2073_v33 = vadd.f32 %v2065_v27, %v4480_v11  ;;  %v2050_v34 = vmul.f32 0.044715, %v4493_v28  ;;  %v1997_v35 = vadd.f32 %v1996_v10, %v1817_v1  ;;  %v2038_v26 = vpop.f32.mrf.mxu0  ;;  %v2042_v11 = vmul.f32 0.5, %v4493_v28 }
 0xc0e   : > { %v2076_v24 = vadd.f32 %v2068_v30, %v4482_v14  ;;  %v2051_v37 = vmul.f32 0.044715, %v4496_v32  ;;  %v2039_v38 = vadd.f32 %v2038_v26, %v1820_v5  ;;  %v2043_v14 = vmul.f32 0.5, %v4496_v32 }
 0xc0f   : > { %v2058_v36 = vmul.f32 %v2050_v34, %v4493_v28  ;;  %v2053_v63 = vmul.f32 0.044715, %v1997_v35  ;;  %v2081_v42 = vmul.f32 0.7978846, %v2073_v33  ;;  %v2045_v19 = vmul.f32 0.5, %v1997_v35 }
 0xc10   : > { %v2059_v39 = vmul.f32 %v2051_v37, %v4496_v32  ;;  %v2056_v41 = vmul.f32 0.044715, %v2039_v38  ;;  %v2084_v43 = vmul.f32 0.7978846, %v2076_v24  ;;  %v2048_v23 = vmul.f32 0.5, %v2039_v38 }
 0xc11   : > { %v2066_v47 = vmul.f32 %v2058_v36, %v4493_v28  ;;  %v2061_v3 = vmul.f32 %v2053_v63, %v1997_v35  ;;  %3409 = vtanh.f32 %v2081_v42 }
 0xc12   : > { %v2067_v44 = vmul.f32 %v2059_v39, %v4496_v32  ;;  %v2064_v46 = vmul.f32 %v2056_v41, %v2039_v38  ;;  %v2010_v48 = vpop.f32.mrf.mxu2  ;;  %3411 = vtanh.f32 %v2084_v43 }
 0xc13   : > { %v2074_v49 = vadd.f32 %v2066_v47, %v4493_v28  ;;  %v2069_v50 = vmul.f32 %v2061_v3, %v1997_v35  ;;  %v2011_v51 = vadd.f32 %v2010_v48, %v1818_v16  ;;  %v2024_v6 = vpop.f32.mrf.mxu3  ;;  %v3366_v28 = vld [vmem:[%s784_s27] ss:$0 sm:$0xff] }
 0xc14   : > { %v2075_v52 = vadd.f32 %v2067_v44, %v4496_v32  ;;  %v2072_v53 = vmul.f32 %v2064_v46, %v2039_v38  ;;  %v2025_v2 = vadd.f32 %v2024_v6, %v1819_v21 }
 0xc15   : > { %v2077_v54 = vadd.f32 %v2069_v50, %v1997_v35  ;;  %v2054_v55 = vmul.f32 0.044715, %v2011_v51  ;;  %v2082_v58 = vmul.f32 0.7978846, %v2074_v49  ;;  %v2046_v35 = vmul.f32 0.5, %v2011_v51 }
 0xc16   : > { %v2080_v56 = vadd.f32 %v2072_v53, %v2039_v38  ;;  %v2055_v57 = vmul.f32 0.044715, %v2025_v2  ;;  %v2083_v61 = vmul.f32 0.7978846, %v2075_v52  ;;  %v2047_v38 = vmul.f32 0.5, %v2025_v2 }
 0xc17   : > { %v2085_v59 = vmul.f32 0.7978846, %v2077_v54  ;;  %v2062_v60 = vmul.f32 %v2054_v55, %v2011_v51  ;;  %v3410_v0 = vpop.eup %3409 }
 0xc18   : > { %v2088_v13 = vmul.f32 0.7978846, %v2080_v56  ;;  %v2063_v62 = vmul.f32 %v2055_v57, %v2025_v2  ;;  %v3412_v1 = vpop.eup %3411  ;;  %v2097_v9 = vadd.f32 1.0, %v3410_v0 }
 0xc19   : > { %v2070_v40 = vmul.f32 %v2062_v60, %v2011_v51  ;;  %3413 = vtanh.f32 %v2085_v59  ;;  %v2100_v15 = vadd.f32 1.0, %v3412_v1 }
 0xc1a   : > { %v2071_v4 = vmul.f32 %v2063_v62, %v2025_v2  ;;  %3415 = vtanh.f32 %v2088_v13  ;;  %v2105_v29 = vmul.f32 %v2097_v9, %v2041_v18 }
 0xc1b   : > { %v2078_v17 = vadd.f32 %v2070_v40, %v2011_v51  ;;  %3417 = vtanh.f32 %v2082_v58  ;;  %v2108_v10 = vmul.f32 %v2100_v15, %v2044_v22 }
 0xc1c   : > { %v2079_v5 = vadd.f32 %v2071_v4, %v2025_v2  ;;  %3419 = vtanh.f32 %v2083_v61 }
 0xc1d   : > { %v2086_v7 = vmul.f32 0.7978846, %v2078_v17 }
 0xc1e   : > { %v2087_v8 = vmul.f32 0.7978846, %v2079_v5 }
 0xc1f   : > { %v3414_v12 = vpop.eup %3413  ;;  %3421 = vtanh.f32 %v2086_v7 }
 0xc20   : > { %v3416_v16 = vpop.eup %3415  ;;  %v2101_v20 = vadd.f32 1.0, %v3414_v12  ;;  %3423 = vtanh.f32 %v2087_v8 }
 0xc21   : > { %v3418_v21 = vpop.eup %3417  ;;  %v2104_v25 = vadd.f32 1.0, %v3416_v16 }
 0xc22   : > { %v3420_v27 = vpop.eup %3419  ;;  %v2109_v30 = vmul.f32 %v2101_v20, %v2045_v19  ;;  %v2098_v26 = vadd.f32 1.0, %v3418_v21 }
 0xc23   : > { %v2112_v33 = vmul.f32 %v2104_v25, %v2048_v23  ;;  %v2099_v36 = vadd.f32 1.0, %v3420_v27 }
 0xc24   : > { %v2113_v34 = vpack.c.bf16 %v2109_v30, %v2105_v29  ;;  %v2106_v42 = vmul.f32 %v2098_v26, %v2042_v11 }
 0xc25   : > { %v3422_v24 = vpop.eup %3421  ;;  %v2116_v37 = vpack.c.bf16 %v2112_v33, %v2108_v10  ;;  %v2107_v3 = vmul.f32 %v2099_v36, %v2043_v14 }
 0xc26   : > { %v3424_v63 = vpop.eup %3423  ;;  %2385 = vmatmul.bf16.vlgmr.msrb.gmra.mxu1 %v2113_v34  ;;  %v2102_v39 = vadd.f32 1.0, %v3422_v24 }
 0xc27   : > { %2427 = vmatmul.bf16.vlgmr.msra.gmra.mxu0 %v2116_v37  ;;  %v2103_v41 = vadd.f32 1.0, %v3424_v63 }
 0xc28   : > { %v2110_v47 = vmul.f32 %v2102_v39, %v2046_v35 }
 0xc29   : > { %v2111_v43 = vmul.f32 %v2103_v41, %v2047_v38 }
 0xc2a   : > { %v2114_v44 = vpack.c.bf16 %v2110_v47, %v2106_v42 }
 0xc2b   : > { %v2115_v46 = vpack.c.bf16 %v2111_v43, %v2107_v3 }
 0xc2c   : > { %2399 = vmatmul.bf16.vlgmr.msrb.gmra.mxu2 %v2114_v44 }
 0xc2d   : > { %2413 = vmatmul.bf16.vlgmr.msrb.gmra.mxu3 %v2115_v46 }
 0xca3   : > { %v2386_v48 = vpop.f32.mrf.mxu1 }
 0xca4   : > { %v2387_v49 = vadd.f32 %v3366_v28, %v2386_v48  ;;  %v2428_v6 = vpop.f32.mrf.mxu0 }
 0xcab   : > { %v2388_v53 = vpop.f32.mrf.mxu1 }
 0xcac   : > { %v2389_v54 = vadd.f32 %v3366_v28, %v2388_v53  ;;  %v2430_v60 = vpop.f32.mrf.mxu0 }
 0xcaf   : > { %v2400_v50 = vpop.f32.mrf.mxu2 }
 0xcb0   : > { %v2401_v51 = vadd.f32 %v2400_v50, %v2387_v49  ;;  %v2414_v32 = vpop.f32.mrf.mxu3 }
 0xcb2   : > { %v2415_v52 = vadd.f32 %v2414_v32, %v2401_v51 }
 0xcb4   : > { %v2429_v2 = vadd.f32 %v2428_v6, %v2415_v52 }
 0xcb6   : > { %v2433_v55 = vadd.f32 %v2429_v2, %v4334_v45 }
 0xcb7   : > { %v2402_v56 = vpop.f32.mrf.mxu2 }
 0xcb8   : > { %2435 = vst [vmem:[#allocation19] sm:$0xff] %v2433_v55  ;;  %v2403_v57 = vadd.f32 %v2402_v56, %v2389_v54  ;;  %v2416_v58 = vpop.f32.mrf.mxu3 }
 0xcba   : > { %v2417_v59 = vadd.f32 %v2416_v58, %v2403_v57 }
 0xcbc   : > { %v2431_v61 = vadd.f32 %v2430_v60, %v2417_v59 }
 0xcbe   : > { %v2434_v13 = vadd.f32 %v2431_v61, %v4359_v31 }
 0xcc0   : > { %2436 = vst [vmem:[#allocation19 + $0x8] sm:$0xff] %v2434_v13 }
 0xcc1   : > { %3257 = dma.vmem_to_hbm [thread:$0]  (%p3295_p3), %s2446_s23, 256, %s2448_s2, [#allocation4], %s3843_s28, %s3843_s28, %s3844_s13  }
 0xcc2   : > { %3802 = dma.done.wait (%p3295_p3), [#allocation4], 256  }
 0xcc3   : > { %3804 = vsyncadd (%p3295_p3), [#allocation4], 4294967040 }
 0xcc4 PF: > { %s39_s26 = sadd.s32 1, %s3827_s26   ;;  %s4591_s14 = sld [smem:[#allocation27_spill]] }
 0xcc5   : > { %p36_p4 = scmp.ge.s32.totalorder %s39_s26, 4   ;;  %s4592_s23 = sld [smem:[#allocation29_spill]] }
 0xcc6   : > { %s4593_s11 = sld [smem:[#allocation28_spill]]  ;;  %s4594_s21 = smov %s3811_s22 }
 0xcc7   : > { %s4596_s24 = smov %s3823_s25 }
 0xcc8   :  { %38 = sbr.rel (!%p36_p4) target bundleno = 23 (0x17), region = 218 }
 0xcca   : > { %s4595_s22 = smov %s4591_s14 }
 0xccc   : > { %s4597_s25 = smov %s4593_s11 }
 0xccd   :  { %2464 = vsyncpa [#allocation3], 1 }
 0xcce   :  { %2466 = vsyncpa [#allocation3 + $0x1], 1 }
 0xccf   :  { %2467 = vsyncpa [#allocation6], 1 }
 0xcd0   :  { %2469 = vsyncpa [#allocation6 + $0x1], 1 }
 0xcd1   :  { %2470 = vsyncpa [#allocation9], 1 }
 0xcd2   :  { %2472 = vsyncpa [#allocation9 + $0x1], 1 }
 0xcd3   :  { %2473 = vsyncpa [#allocation12], 1 }
 0xcd4   :  { %2475 = vsyncpa [#allocation12 + $0x1], 1 }
 0xcd5   :  { %2476 = vsyncpa [#allocation15], 1 }
 0xcd6   :  { %2478 = vsyncpa [#allocation15 + $0x1], 1 }
 0xcd7   :  { %2479 = vsyncpa [#allocation18], 1 }
 0xcd8   :  { %2481 = vsyncpa [#allocation18 + $0x1], 1 }
 0xcd9   :  { %2482 = vsyncpa [#allocation4], 1 }
 0xcda   :  { %2484 = vsyncpa [#allocation4 + $0x1], 1 }

</bundles_post_ra>
